<compile_context>
chip_gen: v6e
topology: v6e:2x2x1
jax: 0.10.0
libtpu: 0.0.40
codegen_flags: <defaults>
</compile_context>

<pallas_src>
import math

import jax
import jax.numpy as jnp
from jax.experimental import pallas as pl
from jax.experimental.pallas import tpu as pltpu

# ----------------------------- model config ---------------------------------
BATCH = 2
SEQ = 8
D_MODEL = 32
N_HEADS = 4
D_FF = 64
N_LAYERS = 2
LN_EPS = 1e-5
NEG_INF = -1e30
MXU_DTYPE = jnp.bfloat16  # MXU operand dtype; accumulation stays f32


def _layernorm(x, gamma, beta, eps=LN_EPS):
    """LayerNorm over the last axis (biased variance, like torch.nn.LayerNorm)."""
    mean = jnp.mean(x, axis=-1, keepdims=True)
    var = jnp.mean((x - mean) ** 2, axis=-1, keepdims=True)
    return (x - mean) * jax.lax.rsqrt(var + eps) * gamma + beta


# ------------------------------ fused kernel ---------------------------------
def _make_encoder_kernel(n_heads, n_layers):
    def kernel(x_ref, bias_ref, ln_ref, wqkv_ref, bqkv_ref, wo_ref, bo_ref,
               w1_ref, b1_ref, w2_ref, b2_ref, fln_ref, out_ref):
        rows, d_model = x_ref.shape          # rows = B*S (batch folded into tokens)
        dk = d_model // n_heads
        nbh = n_heads * rows                 # head-major flattened row count

        x = x_ref[...].astype(jnp.float32)   # (B*S, D), activations in f32
        bias = bias_ref[...]                 # (H*B*S, H*B*S) additive mask bias

        def to_heads(t):                     # (B*S, D) -> (H*B*S, dk), rows = (h,b,s)
            return jnp.swapaxes(t.reshape(rows, n_heads, dk), 0, 1).reshape(nbh, dk)

        for l in range(n_layers):            # static unroll (N_LAYERS small)
            ln = ln_ref[l]                   # (4, D): [ln1_g, ln1_b, ln2_g, ln2_b]

            # ---- self-attention block (pre-norm) ----------------------------
            z = _layernorm(x, ln[0:1], ln[1:2])
            # fused QKV projection; 1/sqrt(dk) is pre-folded into the q columns
            qkv = jnp.dot(z.astype(MXU_DTYPE), wqkv_ref[l],
                          preferred_element_type=jnp.float32) + bqkv_ref[l]  # (BS, 3D)
            q = to_heads(qkv[:, 0:d_model])
            k = to_heads(qkv[:, d_model:2 * d_model])
            v = to_heads(qkv[:, 2 * d_model:])
            # one block-masked matmul covers all (head, batch) blocks at once
            scores = jnp.einsum('qd,kd->qk',
                                q.astype(MXU_DTYPE), k.astype(MXU_DTYPE),
                                preferred_element_type=jnp.float32) + bias
            scores = scores - jnp.max(scores, axis=-1, keepdims=True)
            e = jnp.exp(scores)
            attn = e * pl.reciprocal(jnp.sum(e, axis=-1, keepdims=True), approx=True)
            ctx = jnp.dot(attn.astype(MXU_DTYPE), v.astype(MXU_DTYPE),
                          preferred_element_type=jnp.float32)            # (HBS, dk)
            ctx = jnp.swapaxes(ctx.reshape(n_heads, rows, dk), 0, 1)
            ctx = ctx.reshape(rows, d_model)                             # (BS, D)
            x = x + (jnp.dot(ctx.astype(MXU_DTYPE), wo_ref[l],
                             preferred_element_type=jnp.float32) + bo_ref[l])

            # ---- feed-forward block (pre-norm) -------------------------------
            z = _layernorm(x, ln[2:3], ln[3:4])
            h1 = jnp.maximum(jnp.dot(z.astype(MXU_DTYPE), w1_ref[l],
                                     preferred_element_type=jnp.float32)
                             + b1_ref[l], 0.0)                            # ReLU
            x = x + (jnp.dot(h1.astype(MXU_DTYPE), w2_ref[l],
                             preferred_element_type=jnp.float32) + b2_ref[l])

        # final LayerNorm
        fln = fln_ref[...]
        out_ref[...] = _layernorm(x, fln[0:1], fln[1:2]).astype(out_ref.dtype)

    return kernel


# ------------------------------ wrapper ---------------------------------------
@jax.jit
def encoder_forward(x, mask, params):
    """x: (B, S, D) f32; mask: (B, S_q, S_k), nonzero = attend."""
    B, S, D = x.shape
    H = N_HEADS
    rows = B * S
    x2 = x.reshape(rows, D)                  # fold batch into the token axis

    # Additive attention bias, built OUTSIDE the kernel. Rows/cols are ordered
    # head-major (h, b, s); entries off the (head, batch) diagonal blocks or at
    # masked keys get -1e30 so a single (HBS x HBS) matmul handles attention
    # for every head and batch item.
    nbh = H * rows
    idx = jnp.arange(nbh)
    h_idx = idx // rows
    b_idx = (idx // S) % B
    s_idx = idx % S
    same_block = (h_idx[:, None] == h_idx[None, :]) & (b_idx[:, None] == b_idx[None, :])
    allowed = mask[b_idx[:, None], s_idx[:, None], s_idx[None, :]] > 0
    bias = jnp.where(same_block & allowed, 0.0, NEG_INF).astype(jnp.float32)

    args = (x2, bias, params["ln"], params["wqkv"], params["bqkv"],
            params["wo"], params["bo"], params["w1"], params["b1"],
            params["w2"], params["b2"], params["fln"])

    def full_spec(a):                        # whole-array block, single grid step
        zeros = (0,) * a.ndim
        return pl.BlockSpec(a.shape, lambda i, _z=zeros: _z)

    grid_spec = pltpu.PrefetchScalarGridSpec(
        num_scalar_prefetch=0,
        grid=(1,),                           # everything resident, one invocation
        in_specs=[full_spec(a) for a in args],
        out_specs=pl.BlockSpec((rows, D), lambda i: (0, 0)),
    )
    out = pl.pallas_call(
        _make_encoder_kernel(H, N_LAYERS),
        out_shape=jax.ShapeDtypeStruct((rows, D), x.dtype),
        grid_spec=grid_spec,
        compiler_params=pltpu.CompilerParams(
            dimension_semantics=("arbitrary",)),
    )(*args)
    return out.reshape(B, S, D)


# --------------------------- parameter init -----------------------------------
def init_params(key, d_model=D_MODEL, d_ff=D_FF, n_layers=N_LAYERS, n_heads=N_HEADS):
    assert d_model % n_heads == 0
    dk = d_model // n_heads
    scale = 1.0 / math.sqrt(dk)

    def linear(k, d_in, d_out):
        kw, kb = jax.random.split(k)
        w = jax.random.normal(kw, (d_in, d_out), jnp.float32) * 0.02   # [in, out]
        b = jax.random.normal(kb, (d_out,), jnp.float32) * 0.02
        return w, b

    ones = jnp.ones((d_model,), jnp.float32)
    zeros = jnp.zeros((d_model,), jnp.float32)
    wqkv_l, bqkv_l, wo_l, bo_l = [], [], [], []
    w1_l, b1_l, w2_l, b2_l, ln_l = [], [], [], [], []
    for i in range(n_layers):
        k = jax.random.fold_in(key, i)
        ks = jax.random.split(k, 6)
        wq, bq = linear(ks[0], d_model, d_model)
        wk, bk = linear(ks[1], d_model, d_model)
        wv, bv = linear(ks[2], d_model, d_model)
        wo, bo = linear(ks[3], d_model, d_model)
        w1, b1 = linear(ks[4], d_model, d_ff)
        w2, b2 = linear(ks[5], d_ff, d_model)
        wq, bq = wq * scale, bq * scale            # fold 1/sqrt(dk) into Wq/bq
        wqkv_l.append(jnp.concatenate([wq, wk, wv], axis=1))             # (D, 3D)
        bqkv_l.append(jnp.concatenate([bq, bk, bv]).reshape(1, 3 * d_model))
        wo_l.append(wo); bo_l.append(bo.reshape(1, d_model))
        w1_l.append(w1); b1_l.append(b1.reshape(1, d_ff))
        w2_l.append(w2); b2_l.append(b2.reshape(1, d_model))
        ln_l.append(jnp.stack([ones, zeros, ones, zeros], axis=0))       # (4, D)

    return dict(
        wqkv=jnp.stack(wqkv_l).astype(MXU_DTYPE),   # (L, D, 3D)   bf16
        bqkv=jnp.stack(bqkv_l),                     # (L, 1, 3D)   f32 (lane-dense)
        wo=jnp.stack(wo_l).astype(MXU_DTYPE),       # (L, D, D)    bf16
        bo=jnp.stack(bo_l),                         # (L, 1, D)    f32
        w1=jnp.stack(w1_l).astype(MXU_DTYPE),       # (L, D, Dff)  bf16
        b1=jnp.stack(b1_l),                         # (L, 1, Dff)  f32
        w2=jnp.stack(w2_l).astype(MXU_DTYPE),       # (L, Dff, D)  bf16
        b2=jnp.stack(b2_l),                         # (L, 1, D)    f32
        ln=jnp.stack(ln_l),                         # (L, 4, D)    f32 LN params
        fln=jnp.stack([ones, zeros], axis=0),       # (2, D)       f32 final LN
    )


# --------------------------- pure-JAX reference --------------------------------
def encoder_reference(x, mask, params):
    B, S, D = x.shape
    H = N_HEADS
    dk = D // H
    wqkv = params["wqkv"].astype(jnp.float32)
    wo = params["wo"].astype(jnp.float32)
    w1 = params["w1"].astype(jnp.float32)
    w2 = params["w2"].astype(jnp.float32)
    mask_bias = jnp.where(mask > 0, 0.0, NEG_INF)                      # (B, S, S)
    for l in range(wqkv.shape[0]):
        g1, be1, g2, be2 = params["ln"][l]
        z = _layernorm(x, g1, be1)
        qkv = z @ wqkv[l] + params["bqkv"][l][0]
        q = qkv[..., 0:D].reshape(B, S, H, dk)
        k = qkv[..., D:2 * D].reshape(B, S, H, dk)
        v = qkv[..., 2 * D:].reshape(B, S, H, dk)
        scores = jnp.einsum('bqhd,bkhd->bhqk', q, k) + mask_bias[:, None]
        attn = jax.nn.softmax(scores, axis=-1)
        ctx = jnp.einsum('bhqk,bkhd->bqhd', attn, v).reshape(B, S, D)
        x = x + ctx @ wo[l] + params["bo"][l][0]
        z = _layernorm(x, g2, be2)
        h1 = jnp.maximum(z @ w1[l] + params["b1"][l][0], 0.0)
        x = x + h1 @ w2[l] + params["b2"][l][0]
    return _layernorm(x, params["fln"][0], params["fln"][1])


# ------------------------------- main ------------------------------------------
if __name__ == "__main__":
    key = jax.random.PRNGKey(0)
    kx, kp = jax.random.split(key)

    x = jax.random.normal(kx, (BATCH, SEQ, D_MODEL), jnp.float32)
    mask = jnp.ones((BATCH, SEQ, SEQ), jnp.float32)  # full (non-causal) attention

    params = init_params(kp)

    out = jax.block_until_ready(encoder_forward(x, mask, params))

    assert out.shape == (BATCH, SEQ, D_MODEL)
    assert bool(jnp.all(jnp.isfinite(out)))
    ref = encoder_reference(x, mask, params)
    assert bool(jnp.allclose(out, ref, atol=2e-2, rtol=2e-2)), "mismatch vs reference"
    print("KERNEL_OK")
</pallas_src>

<mosaic_0001>
module attributes {stable_mosaic.version = 11 : i64} {
  func.func @kernel(%arg0: i32, %arg1: memref<16x32xf32, #tpu.memory_space<vmem>>, %arg2: memref<64x64xf32, #tpu.memory_space<vmem>>, %arg3: memref<2x4x32xf32, #tpu.memory_space<vmem>>, %arg4: memref<2x32x96xbf16, #tpu.memory_space<vmem>>, %arg5: memref<2x1x96xf32, #tpu.memory_space<vmem>>, %arg6: memref<2x32x32xbf16, #tpu.memory_space<vmem>>, %arg7: memref<2x1x32xf32, #tpu.memory_space<vmem>>, %arg8: memref<2x32x64xbf16, #tpu.memory_space<vmem>>, %arg9: memref<2x1x64xf32, #tpu.memory_space<vmem>>, %arg10: memref<2x64x32xbf16, #tpu.memory_space<vmem>>, %arg11: memref<2x1x32xf32, #tpu.memory_space<vmem>>, %arg12: memref<2x32xf32, #tpu.memory_space<vmem>>, %arg13: memref<16x32xf32, #tpu.memory_space<vmem>>) attributes {dimension_semantics = [#tpu.dimension_semantics<arbitrary>], iteration_bounds = array<i64: 1>, scalar_prefetch = 0 : i64, scratch_operands = 0 : i64, tpu.core_type = #tpu.core_type<tc>, window_params = [{pipeline_mode = #tpu.pipeline_mode<synchronous>, transform_indices = @transform_0, window_bounds = array<i64: 16, 32>}, {pipeline_mode = #tpu.pipeline_mode<synchronous>, transform_indices = @transform_1, window_bounds = array<i64: 64, 64>}, {pipeline_mode = #tpu.pipeline_mode<synchronous>, transform_indices = @transform_2, window_bounds = array<i64: 2, 4, 32>}, {pipeline_mode = #tpu.pipeline_mode<synchronous>, transform_indices = @transform_3, window_bounds = array<i64: 2, 32, 96>}, {pipeline_mode = #tpu.pipeline_mode<synchronous>, transform_indices = @transform_4, window_bounds = array<i64: 2, 1, 96>}, {pipeline_mode = #tpu.pipeline_mode<synchronous>, transform_indices = @transform_5, window_bounds = array<i64: 2, 32, 32>}, {pipeline_mode = #tpu.pipeline_mode<synchronous>, transform_indices = @transform_6, window_bounds = array<i64: 2, 1, 32>}, {pipeline_mode = #tpu.pipeline_mode<synchronous>, transform_indices = @transform_7, window_bounds = array<i64: 2, 32, 64>}, {pipeline_mode = #tpu.pipeline_mode<synchronous>, transform_indices = @transform_8, window_bounds = array<i64: 2, 1, 64>}, {pipeline_mode = #tpu.pipeline_mode<synchronous>, transform_indices = @transform_9, window_bounds = array<i64: 2, 64, 32>}, {pipeline_mode = #tpu.pipeline_mode<synchronous>, transform_indices = @transform_10, window_bounds = array<i64: 2, 1, 32>}, {pipeline_mode = #tpu.pipeline_mode<synchronous>, transform_indices = @transform_11, window_bounds = array<i64: 2, 32>}, {pipeline_mode = #tpu.pipeline_mode<synchronous>, transform_indices = @transform_12, window_bounds = array<i64: 16, 32>}]} {
    %c0 = arith.constant 0 : index
    %c0_0 = arith.constant 0 : index
    %0 = vector.load %arg1[%c0, %c0_0] : memref<16x32xf32, #tpu.memory_space<vmem>>, vector<16x32xf32>
    %c0_1 = arith.constant 0 : index
    %c0_2 = arith.constant 0 : index
    %1 = vector.load %arg2[%c0_1, %c0_2] : memref<64x64xf32, #tpu.memory_space<vmem>>, vector<64x64xf32>
    %c0_3 = arith.constant 0 : index
    %c0_4 = arith.constant 0 : index
    %c0_5 = arith.constant 0 : index
    %2 = vector.load %arg3[%c0_3, %c0_4, %c0_5] : memref<2x4x32xf32, #tpu.memory_space<vmem>>, vector<1x4x32xf32>
    %3 = vector.shape_cast %2 : vector<1x4x32xf32> to vector<4x32xf32>
    %4 = vector.extract_strided_slice %3 {offsets = [0, 0], sizes = [1, 32], strides = [1, 1]} : vector<4x32xf32> to vector<1x32xf32>
    %5 = vector.extract_strided_slice %3 {offsets = [1, 0], sizes = [1, 32], strides = [1, 1]} : vector<4x32xf32> to vector<1x32xf32>
    %cst = arith.constant dense<0.000000e+00> : vector<16xf32>
    %6 = vector.multi_reduction <add>, %0, %cst [1] : vector<16x32xf32> to vector<16xf32>
    %7 = vector.shape_cast %6 : vector<16xf32> to vector<16x1xf32>
    %cst_6 = arith.constant 3.200000e+01 : f32
    %8 = vector.broadcast %cst_6 : f32 to vector<16x1xf32>
    %9 = arith.divf %7, %8 : vector<16x1xf32>
    %10 = vector.broadcast %9 : vector<16x1xf32> to vector<16x32xf32>
    %11 = arith.subf %0, %10 : vector<16x32xf32>
    %12 = arith.mulf %11, %11 : vector<16x32xf32>
    %cst_7 = arith.constant dense<0.000000e+00> : vector<16xf32>
    %13 = vector.multi_reduction <add>, %12, %cst_7 [1] : vector<16x32xf32> to vector<16xf32>
    %14 = vector.shape_cast %13 : vector<16xf32> to vector<16x1xf32>
    %cst_8 = arith.constant 3.200000e+01 : f32
    %15 = vector.broadcast %cst_8 : f32 to vector<16x1xf32>
    %16 = arith.divf %14, %15 : vector<16x1xf32>
    %17 = vector.broadcast %9 : vector<16x1xf32> to vector<16x32xf32>
    %18 = arith.subf %0, %17 : vector<16x32xf32>
    %cst_9 = arith.constant 9.99999974E-6 : f32
    %19 = vector.broadcast %cst_9 : f32 to vector<16x1xf32>
    %20 = arith.addf %16, %19 : vector<16x1xf32>
    %21 = math.rsqrt %20 : vector<16x1xf32>
    %22 = vector.broadcast %21 : vector<16x1xf32> to vector<16x32xf32>
    %23 = arith.mulf %18, %22 : vector<16x32xf32>
    %24 = vector.broadcast %4 : vector<1x32xf32> to vector<16x32xf32>
    %25 = arith.mulf %23, %24 : vector<16x32xf32>
    %26 = vector.broadcast %5 : vector<1x32xf32> to vector<16x32xf32>
    %27 = arith.addf %25, %26 : vector<16x32xf32>
    %28 = arith.truncf %27 : vector<16x32xf32> to vector<16x32xbf16>
    %c0_10 = arith.constant 0 : index
    %c0_11 = arith.constant 0 : index
    %c0_12 = arith.constant 0 : index
    %29 = vector.load %arg4[%c0_10, %c0_11, %c0_12] : memref<2x32x96xbf16, #tpu.memory_space<vmem>>, vector<1x32x96xbf16>
    %30 = vector.shape_cast %29 : vector<1x32x96xbf16> to vector<32x96xbf16>
    %cst_13 = arith.constant dense<0.000000e+00> : vector<16x96xf32>
    %31 = tpu.matmul %28, %30, %cst_13 {dimension_numbers = #tpu.dot_dimension_numbers<[1], [0], [0], [1], [0, 0, 1, 1], [], []>} : vector<16x32xbf16>, vector<32x96xbf16>, vector<16x96xf32> -> vector<16x96xf32>
    %c0_14 = arith.constant 0 : index
    %c0_15 = arith.constant 0 : index
    %c0_16 = arith.constant 0 : index
    %32 = vector.load %arg5[%c0_14, %c0_15, %c0_16] : memref<2x1x96xf32, #tpu.memory_space<vmem>>, vector<1x1x96xf32>
    %33 = vector.shape_cast %32 : vector<1x1x96xf32> to vector<1x96xf32>
    %34 = vector.broadcast %33 : vector<1x96xf32> to vector<16x96xf32>
    %35 = arith.addf %31, %34 : vector<16x96xf32>
    %36 = vector.extract_strided_slice %35 {offsets = [0, 0], sizes = [16, 32], strides = [1, 1]} : vector<16x96xf32> to vector<16x32xf32>
    %37 = vector.shape_cast %36 : vector<16x32xf32> to vector<16x4x8xf32>
    %38 = tpu.transpose %37, [1, 0, 2] : vector<16x4x8xf32> -> vector<4x16x8xf32>
    %39 = vector.shape_cast %38 : vector<4x16x8xf32> to vector<64x8xf32>
    %40 = vector.extract_strided_slice %35 {offsets = [0, 32], sizes = [16, 32], strides = [1, 1]} : vector<16x96xf32> to vector<16x32xf32>
    %41 = vector.shape_cast %40 : vector<16x32xf32> to vector<16x4x8xf32>
    %42 = tpu.transpose %41, [1, 0, 2] : vector<16x4x8xf32> -> vector<4x16x8xf32>
    %43 = vector.shape_cast %42 : vector<4x16x8xf32> to vector<64x8xf32>
    %44 = vector.extract_strided_slice %35 {offsets = [0, 64], sizes = [16, 32], strides = [1, 1]} : vector<16x96xf32> to vector<16x32xf32>
    %45 = vector.shape_cast %44 : vector<16x32xf32> to vector<16x4x8xf32>
    %46 = tpu.transpose %45, [1, 0, 2] : vector<16x4x8xf32> -> vector<4x16x8xf32>
    %47 = vector.shape_cast %46 : vector<4x16x8xf32> to vector<64x8xf32>
    %48 = arith.truncf %39 : vector<64x8xf32> to vector<64x8xbf16>
    %49 = arith.truncf %43 : vector<64x8xf32> to vector<64x8xbf16>
    "tpu.trace_start"() <{level = 10 : i32, message = "qd,kd->qk"}> : () -> ()
    %cst_17 = arith.constant dense<0.000000e+00> : vector<64x64xf32>
    %50 = tpu.matmul %48, %49, %cst_17 {dimension_numbers = #tpu.dot_dimension_numbers<[1], [1], [0], [0], [0, 0, 1, 0], [], []>} : vector<64x8xbf16>, vector<64x8xbf16>, vector<64x64xf32> -> vector<64x64xf32>
    "tpu.trace_stop"() : () -> ()
    %51 = arith.addf %50, %1 : vector<64x64xf32>
    %cst_18 = arith.constant dense<0xFF800000> : vector<64xf32>
    %52 = vector.multi_reduction <maximumf>, %51, %cst_18 [1] : vector<64x64xf32> to vector<64xf32>
    %53 = vector.shape_cast %52 : vector<64xf32> to vector<64x1xf32>
    %54 = vector.broadcast %53 : vector<64x1xf32> to vector<64x64xf32>
    %55 = arith.subf %51, %54 : vector<64x64xf32>
    %56 = math.exp %55 : vector<64x64xf32>
    %cst_19 = arith.constant dense<0.000000e+00> : vector<64xf32>
    %57 = vector.multi_reduction <add>, %56, %cst_19 [1] : vector<64x64xf32> to vector<64xf32>
    %58 = vector.shape_cast %57 : vector<64xf32> to vector<64x1xf32>
    %59 = tpu.reciprocal %58 {approx = true} : vector<64x1xf32> -> vector<64x1xf32>
    %60 = vector.broadcast %59 : vector<64x1xf32> to vector<64x64xf32>
    %61 = arith.mulf %56, %60 : vector<64x64xf32>
    %62 = arith.truncf %61 : vector<64x64xf32> to vector<64x64xbf16>
    %63 = arith.truncf %47 : vector<64x8xf32> to vector<64x8xbf16>
    %cst_20 = arith.constant dense<0.000000e+00> : vector<64x8xf32>
    %64 = tpu.matmul %62, %63, %cst_20 {dimension_numbers = #tpu.dot_dimension_numbers<[1], [0], [0], [1], [0, 0, 1, 1], [], []>} : vector<64x64xbf16>, vector<64x8xbf16>, vector<64x8xf32> -> vector<64x8xf32>
    %65 = vector.shape_cast %64 : vector<64x8xf32> to vector<4x16x8xf32>
    %66 = tpu.transpose %65, [1, 0, 2] : vector<4x16x8xf32> -> vector<16x4x8xf32>
    %67 = vector.shape_cast %66 : vector<16x4x8xf32> to vector<16x32xf32>
    %68 = arith.truncf %67 : vector<16x32xf32> to vector<16x32xbf16>
    %c0_21 = arith.constant 0 : index
    %c0_22 = arith.constant 0 : index
    %c0_23 = arith.constant 0 : index
    %69 = vector.load %arg6[%c0_21, %c0_22, %c0_23] : memref<2x32x32xbf16, #tpu.memory_space<vmem>>, vector<1x32x32xbf16>
    %70 = vector.shape_cast %69 : vector<1x32x32xbf16> to vector<32x32xbf16>
    %cst_24 = arith.constant dense<0.000000e+00> : vector<16x32xf32>
    %71 = tpu.matmul %68, %70, %cst_24 {dimension_numbers = #tpu.dot_dimension_numbers<[1], [0], [0], [1], [0, 0, 1, 1], [], []>} : vector<16x32xbf16>, vector<32x32xbf16>, vector<16x32xf32> -> vector<16x32xf32>
    %c0_25 = arith.constant 0 : index
    %c0_26 = arith.constant 0 : index
    %c0_27 = arith.constant 0 : index
    %72 = vector.load %arg7[%c0_25, %c0_26, %c0_27] : memref<2x1x32xf32, #tpu.memory_space<vmem>>, vector<1x1x32xf32>
    %73 = vector.shape_cast %72 : vector<1x1x32xf32> to vector<1x32xf32>
    %74 = vector.broadcast %73 : vector<1x32xf32> to vector<16x32xf32>
    %75 = arith.addf %71, %74 : vector<16x32xf32>
    %76 = arith.addf %0, %75 : vector<16x32xf32>
    %77 = vector.extract_strided_slice %3 {offsets = [2, 0], sizes = [1, 32], strides = [1, 1]} : vector<4x32xf32> to vector<1x32xf32>
    %78 = vector.extract_strided_slice %3 {offsets = [3, 0], sizes = [1, 32], strides = [1, 1]} : vector<4x32xf32> to vector<1x32xf32>
    %cst_28 = arith.constant dense<0.000000e+00> : vector<16xf32>
    %79 = vector.multi_reduction <add>, %76, %cst_28 [1] : vector<16x32xf32> to vector<16xf32>
    %80 = vector.shape_cast %79 : vector<16xf32> to vector<16x1xf32>
    %cst_29 = arith.constant 3.200000e+01 : f32
    %81 = vector.broadcast %cst_29 : f32 to vector<16x1xf32>
    %82 = arith.divf %80, %81 : vector<16x1xf32>
    %83 = vector.broadcast %82 : vector<16x1xf32> to vector<16x32xf32>
    %84 = arith.subf %76, %83 : vector<16x32xf32>
    %85 = arith.mulf %84, %84 : vector<16x32xf32>
    %cst_30 = arith.constant dense<0.000000e+00> : vector<16xf32>
    %86 = vector.multi_reduction <add>, %85, %cst_30 [1] : vector<16x32xf32> to vector<16xf32>
    %87 = vector.shape_cast %86 : vector<16xf32> to vector<16x1xf32>
    %cst_31 = arith.constant 3.200000e+01 : f32
    %88 = vector.broadcast %cst_31 : f32 to vector<16x1xf32>
    %89 = arith.divf %87, %88 : vector<16x1xf32>
    %90 = vector.broadcast %82 : vector<16x1xf32> to vector<16x32xf32>
    %91 = arith.subf %76, %90 : vector<16x32xf32>
    %cst_32 = arith.constant 9.99999974E-6 : f32
    %92 = vector.broadcast %cst_32 : f32 to vector<16x1xf32>
    %93 = arith.addf %89, %92 : vector<16x1xf32>
    %94 = math.rsqrt %93 : vector<16x1xf32>
    %95 = vector.broadcast %94 : vector<16x1xf32> to vector<16x32xf32>
    %96 = arith.mulf %91, %95 : vector<16x32xf32>
    %97 = vector.broadcast %77 : vector<1x32xf32> to vector<16x32xf32>
    %98 = arith.mulf %96, %97 : vector<16x32xf32>
    %99 = vector.broadcast %78 : vector<1x32xf32> to vector<16x32xf32>
    %100 = arith.addf %98, %99 : vector<16x32xf32>
    %101 = arith.truncf %100 : vector<16x32xf32> to vector<16x32xbf16>
    %c0_33 = arith.constant 0 : index
    %c0_34 = arith.constant 0 : index
    %c0_35 = arith.constant 0 : index
    %102 = vector.load %arg8[%c0_33, %c0_34, %c0_35] : memref<2x32x64xbf16, #tpu.memory_space<vmem>>, vector<1x32x64xbf16>
    %103 = vector.shape_cast %102 : vector<1x32x64xbf16> to vector<32x64xbf16>
    %cst_36 = arith.constant dense<0.000000e+00> : vector<16x64xf32>
    %104 = tpu.matmul %101, %103, %cst_36 {dimension_numbers = #tpu.dot_dimension_numbers<[1], [0], [0], [1], [0, 0, 1, 1], [], []>} : vector<16x32xbf16>, vector<32x64xbf16>, vector<16x64xf32> -> vector<16x64xf32>
    %c0_37 = arith.constant 0 : index
    %c0_38 = arith.constant 0 : index
    %c0_39 = arith.constant 0 : index
    %105 = vector.load %arg9[%c0_37, %c0_38, %c0_39] : memref<2x1x64xf32, #tpu.memory_space<vmem>>, vector<1x1x64xf32>
    %106 = vector.shape_cast %105 : vector<1x1x64xf32> to vector<1x64xf32>
    %107 = vector.broadcast %106 : vector<1x64xf32> to vector<16x64xf32>
    %108 = arith.addf %104, %107 : vector<16x64xf32>
    %cst_40 = arith.constant 0.000000e+00 : f32
    %109 = vector.broadcast %cst_40 : f32 to vector<16x64xf32>
    %110 = arith.maximumf %108, %109 : vector<16x64xf32>
    %111 = arith.truncf %110 : vector<16x64xf32> to vector<16x64xbf16>
    %c0_41 = arith.constant 0 : index
    %c0_42 = arith.constant 0 : index
    %c0_43 = arith.constant 0 : index
    %112 = vector.load %arg10[%c0_41, %c0_42, %c0_43] : memref<2x64x32xbf16, #tpu.memory_space<vmem>>, vector<1x64x32xbf16>
    %113 = vector.shape_cast %112 : vector<1x64x32xbf16> to vector<64x32xbf16>
    %cst_44 = arith.constant dense<0.000000e+00> : vector<16x32xf32>
    %114 = tpu.matmul %111, %113, %cst_44 {dimension_numbers = #tpu.dot_dimension_numbers<[1], [0], [0], [1], [0, 0, 1, 1], [], []>} : vector<16x64xbf16>, vector<64x32xbf16>, vector<16x32xf32> -> vector<16x32xf32>
    %c0_45 = arith.constant 0 : index
    %c0_46 = arith.constant 0 : index
    %c0_47 = arith.constant 0 : index
    %115 = vector.load %arg11[%c0_45, %c0_46, %c0_47] : memref<2x1x32xf32, #tpu.memory_space<vmem>>, vector<1x1x32xf32>
    %116 = vector.shape_cast %115 : vector<1x1x32xf32> to vector<1x32xf32>
    %117 = vector.broadcast %116 : vector<1x32xf32> to vector<16x32xf32>
    %118 = arith.addf %114, %117 : vector<16x32xf32>
    %119 = arith.addf %76, %118 : vector<16x32xf32>
    %c1 = arith.constant 1 : index
    %c0_48 = arith.constant 0 : index
    %c0_49 = arith.constant 0 : index
    %120 = vector.load %arg3[%c1, %c0_48, %c0_49] : memref<2x4x32xf32, #tpu.memory_space<vmem>>, vector<1x4x32xf32>
    %121 = vector.shape_cast %120 : vector<1x4x32xf32> to vector<4x32xf32>
    %122 = vector.extract_strided_slice %121 {offsets = [0, 0], sizes = [1, 32], strides = [1, 1]} : vector<4x32xf32> to vector<1x32xf32>
    %123 = vector.extract_strided_slice %121 {offsets = [1, 0], sizes = [1, 32], strides = [1, 1]} : vector<4x32xf32> to vector<1x32xf32>
    %cst_50 = arith.constant dense<0.000000e+00> : vector<16xf32>
    %124 = vector.multi_reduction <add>, %119, %cst_50 [1] : vector<16x32xf32> to vector<16xf32>
    %125 = vector.shape_cast %124 : vector<16xf32> to vector<16x1xf32>
    %cst_51 = arith.constant 3.200000e+01 : f32
    %126 = vector.broadcast %cst_51 : f32 to vector<16x1xf32>
    %127 = arith.divf %125, %126 : vector<16x1xf32>
    %128 = vector.broadcast %127 : vector<16x1xf32> to vector<16x32xf32>
    %129 = arith.subf %119, %128 : vector<16x32xf32>
    %130 = arith.mulf %129, %129 : vector<16x32xf32>
    %cst_52 = arith.constant dense<0.000000e+00> : vector<16xf32>
    %131 = vector.multi_reduction <add>, %130, %cst_52 [1] : vector<16x32xf32> to vector<16xf32>
    %132 = vector.shape_cast %131 : vector<16xf32> to vector<16x1xf32>
    %cst_53 = arith.constant 3.200000e+01 : f32
    %133 = vector.broadcast %cst_53 : f32 to vector<16x1xf32>
    %134 = arith.divf %132, %133 : vector<16x1xf32>
    %135 = vector.broadcast %127 : vector<16x1xf32> to vector<16x32xf32>
    %136 = arith.subf %119, %135 : vector<16x32xf32>
    %cst_54 = arith.constant 9.99999974E-6 : f32
    %137 = vector.broadcast %cst_54 : f32 to vector<16x1xf32>
    %138 = arith.addf %134, %137 : vector<16x1xf32>
    %139 = math.rsqrt %138 : vector<16x1xf32>
    %140 = vector.broadcast %139 : vector<16x1xf32> to vector<16x32xf32>
    %141 = arith.mulf %136, %140 : vector<16x32xf32>
    %142 = vector.broadcast %122 : vector<1x32xf32> to vector<16x32xf32>
    %143 = arith.mulf %141, %142 : vector<16x32xf32>
    %144 = vector.broadcast %123 : vector<1x32xf32> to vector<16x32xf32>
    %145 = arith.addf %143, %144 : vector<16x32xf32>
    %146 = arith.truncf %145 : vector<16x32xf32> to vector<16x32xbf16>
    %c1_55 = arith.constant 1 : index
    %c0_56 = arith.constant 0 : index
    %c0_57 = arith.constant 0 : index
    %147 = vector.load %arg4[%c1_55, %c0_56, %c0_57] : memref<2x32x96xbf16, #tpu.memory_space<vmem>>, vector<1x32x96xbf16>
    %148 = vector.shape_cast %147 : vector<1x32x96xbf16> to vector<32x96xbf16>
    %cst_58 = arith.constant dense<0.000000e+00> : vector<16x96xf32>
    %149 = tpu.matmul %146, %148, %cst_58 {dimension_numbers = #tpu.dot_dimension_numbers<[1], [0], [0], [1], [0, 0, 1, 1], [], []>} : vector<16x32xbf16>, vector<32x96xbf16>, vector<16x96xf32> -> vector<16x96xf32>
    %c1_59 = arith.constant 1 : index
    %c0_60 = arith.constant 0 : index
    %c0_61 = arith.constant 0 : index
    %150 = vector.load %arg5[%c1_59, %c0_60, %c0_61] : memref<2x1x96xf32, #tpu.memory_space<vmem>>, vector<1x1x96xf32>
    %151 = vector.shape_cast %150 : vector<1x1x96xf32> to vector<1x96xf32>
    %152 = vector.broadcast %151 : vector<1x96xf32> to vector<16x96xf32>
    %153 = arith.addf %149, %152 : vector<16x96xf32>
    %154 = vector.extract_strided_slice %153 {offsets = [0, 0], sizes = [16, 32], strides = [1, 1]} : vector<16x96xf32> to vector<16x32xf32>
    %155 = vector.shape_cast %154 : vector<16x32xf32> to vector<16x4x8xf32>
    %156 = tpu.transpose %155, [1, 0, 2] : vector<16x4x8xf32> -> vector<4x16x8xf32>
    %157 = vector.shape_cast %156 : vector<4x16x8xf32> to vector<64x8xf32>
    %158 = vector.extract_strided_slice %153 {offsets = [0, 32], sizes = [16, 32], strides = [1, 1]} : vector<16x96xf32> to vector<16x32xf32>
    %159 = vector.shape_cast %158 : vector<16x32xf32> to vector<16x4x8xf32>
    %160 = tpu.transpose %159, [1, 0, 2] : vector<16x4x8xf32> -> vector<4x16x8xf32>
    %161 = vector.shape_cast %160 : vector<4x16x8xf32> to vector<64x8xf32>
    %162 = vector.extract_strided_slice %153 {offsets = [0, 64], sizes = [16, 32], strides = [1, 1]} : vector<16x96xf32> to vector<16x32xf32>
    %163 = vector.shape_cast %162 : vector<16x32xf32> to vector<16x4x8xf32>
    %164 = tpu.transpose %163, [1, 0, 2] : vector<16x4x8xf32> -> vector<4x16x8xf32>
    %165 = vector.shape_cast %164 : vector<4x16x8xf32> to vector<64x8xf32>
    %166 = arith.truncf %157 : vector<64x8xf32> to vector<64x8xbf16>
    %167 = arith.truncf %161 : vector<64x8xf32> to vector<64x8xbf16>
    "tpu.trace_start"() <{level = 10 : i32, message = "qd,kd->qk"}> : () -> ()
    %cst_62 = arith.constant dense<0.000000e+00> : vector<64x64xf32>
    %168 = tpu.matmul %166, %167, %cst_62 {dimension_numbers = #tpu.dot_dimension_numbers<[1], [1], [0], [0], [0, 0, 1, 0], [], []>} : vector<64x8xbf16>, vector<64x8xbf16>, vector<64x64xf32> -> vector<64x64xf32>
    "tpu.trace_stop"() : () -> ()
    %169 = arith.addf %168, %1 : vector<64x64xf32>
    %cst_63 = arith.constant dense<0xFF800000> : vector<64xf32>
    %170 = vector.multi_reduction <maximumf>, %169, %cst_63 [1] : vector<64x64xf32> to vector<64xf32>
    %171 = vector.shape_cast %170 : vector<64xf32> to vector<64x1xf32>
    %172 = vector.broadcast %171 : vector<64x1xf32> to vector<64x64xf32>
    %173 = arith.subf %169, %172 : vector<64x64xf32>
    %174 = math.exp %173 : vector<64x64xf32>
    %cst_64 = arith.constant dense<0.000000e+00> : vector<64xf32>
    %175 = vector.multi_reduction <add>, %174, %cst_64 [1] : vector<64x64xf32> to vector<64xf32>
    %176 = vector.shape_cast %175 : vector<64xf32> to vector<64x1xf32>
    %177 = tpu.reciprocal %176 {approx = true} : vector<64x1xf32> -> vector<64x1xf32>
    %178 = vector.broadcast %177 : vector<64x1xf32> to vector<64x64xf32>
    %179 = arith.mulf %174, %178 : vector<64x64xf32>
    %180 = arith.truncf %179 : vector<64x64xf32> to vector<64x64xbf16>
    %181 = arith.truncf %165 : vector<64x8xf32> to vector<64x8xbf16>
    %cst_65 = arith.constant dense<0.000000e+00> : vector<64x8xf32>
    %182 = tpu.matmul %180, %181, %cst_65 {dimension_numbers = #tpu.dot_dimension_numbers<[1], [0], [0], [1], [0, 0, 1, 1], [], []>} : vector<64x64xbf16>, vector<64x8xbf16>, vector<64x8xf32> -> vector<64x8xf32>
    %183 = vector.shape_cast %182 : vector<64x8xf32> to vector<4x16x8xf32>
    %184 = tpu.transpose %183, [1, 0, 2] : vector<4x16x8xf32> -> vector<16x4x8xf32>
    %185 = vector.shape_cast %184 : vector<16x4x8xf32> to vector<16x32xf32>
    %186 = arith.truncf %185 : vector<16x32xf32> to vector<16x32xbf16>
    %c1_66 = arith.constant 1 : index
    %c0_67 = arith.constant 0 : index
    %c0_68 = arith.constant 0 : index
    %187 = vector.load %arg6[%c1_66, %c0_67, %c0_68] : memref<2x32x32xbf16, #tpu.memory_space<vmem>>, vector<1x32x32xbf16>
    %188 = vector.shape_cast %187 : vector<1x32x32xbf16> to vector<32x32xbf16>
    %cst_69 = arith.constant dense<0.000000e+00> : vector<16x32xf32>
    %189 = tpu.matmul %186, %188, %cst_69 {dimension_numbers = #tpu.dot_dimension_numbers<[1], [0], [0], [1], [0, 0, 1, 1], [], []>} : vector<16x32xbf16>, vector<32x32xbf16>, vector<16x32xf32> -> vector<16x32xf32>
    %c1_70 = arith.constant 1 : index
    %c0_71 = arith.constant 0 : index
    %c0_72 = arith.constant 0 : index
    %190 = vector.load %arg7[%c1_70, %c0_71, %c0_72] : memref<2x1x32xf32, #tpu.memory_space<vmem>>, vector<1x1x32xf32>
    %191 = vector.shape_cast %190 : vector<1x1x32xf32> to vector<1x32xf32>
    %192 = vector.broadcast %191 : vector<1x32xf32> to vector<16x32xf32>
    %193 = arith.addf %189, %192 : vector<16x32xf32>
    %194 = arith.addf %119, %193 : vector<16x32xf32>
    %195 = vector.extract_strided_slice %121 {offsets = [2, 0], sizes = [1, 32], strides = [1, 1]} : vector<4x32xf32> to vector<1x32xf32>
    %196 = vector.extract_strided_slice %121 {offsets = [3, 0], sizes = [1, 32], strides = [1, 1]} : vector<4x32xf32> to vector<1x32xf32>
    %cst_73 = arith.constant dense<0.000000e+00> : vector<16xf32>
    %197 = vector.multi_reduction <add>, %194, %cst_73 [1] : vector<16x32xf32> to vector<16xf32>
    %198 = vector.shape_cast %197 : vector<16xf32> to vector<16x1xf32>
    %cst_74 = arith.constant 3.200000e+01 : f32
    %199 = vector.broadcast %cst_74 : f32 to vector<16x1xf32>
    %200 = arith.divf %198, %199 : vector<16x1xf32>
    %201 = vector.broadcast %200 : vector<16x1xf32> to vector<16x32xf32>
    %202 = arith.subf %194, %201 : vector<16x32xf32>
    %203 = arith.mulf %202, %202 : vector<16x32xf32>
    %cst_75 = arith.constant dense<0.000000e+00> : vector<16xf32>
    %204 = vector.multi_reduction <add>, %203, %cst_75 [1] : vector<16x32xf32> to vector<16xf32>
    %205 = vector.shape_cast %204 : vector<16xf32> to vector<16x1xf32>
    %cst_76 = arith.constant 3.200000e+01 : f32
    %206 = vector.broadcast %cst_76 : f32 to vector<16x1xf32>
    %207 = arith.divf %205, %206 : vector<16x1xf32>
    %208 = vector.broadcast %200 : vector<16x1xf32> to vector<16x32xf32>
    %209 = arith.subf %194, %208 : vector<16x32xf32>
    %cst_77 = arith.constant 9.99999974E-6 : f32
    %210 = vector.broadcast %cst_77 : f32 to vector<16x1xf32>
    %211 = arith.addf %207, %210 : vector<16x1xf32>
    %212 = math.rsqrt %211 : vector<16x1xf32>
    %213 = vector.broadcast %212 : vector<16x1xf32> to vector<16x32xf32>
    %214 = arith.mulf %209, %213 : vector<16x32xf32>
    %215 = vector.broadcast %195 : vector<1x32xf32> to vector<16x32xf32>
    %216 = arith.mulf %214, %215 : vector<16x32xf32>
    %217 = vector.broadcast %196 : vector<1x32xf32> to vector<16x32xf32>
    %218 = arith.addf %216, %217 : vector<16x32xf32>
    %219 = arith.truncf %218 : vector<16x32xf32> to vector<16x32xbf16>
    %c1_78 = arith.constant 1 : index
    %c0_79 = arith.constant 0 : index
    %c0_80 = arith.constant 0 : index
    %220 = vector.load %arg8[%c1_78, %c0_79, %c0_80] : memref<2x32x64xbf16, #tpu.memory_space<vmem>>, vector<1x32x64xbf16>
    %221 = vector.shape_cast %220 : vector<1x32x64xbf16> to vector<32x64xbf16>
    %cst_81 = arith.constant dense<0.000000e+00> : vector<16x64xf32>
    %222 = tpu.matmul %219, %221, %cst_81 {dimension_numbers = #tpu.dot_dimension_numbers<[1], [0], [0], [1], [0, 0, 1, 1], [], []>} : vector<16x32xbf16>, vector<32x64xbf16>, vector<16x64xf32> -> vector<16x64xf32>
    %c1_82 = arith.constant 1 : index
    %c0_83 = arith.constant 0 : index
    %c0_84 = arith.constant 0 : index
    %223 = vector.load %arg9[%c1_82, %c0_83, %c0_84] : memref<2x1x64xf32, #tpu.memory_space<vmem>>, vector<1x1x64xf32>
    %224 = vector.shape_cast %223 : vector<1x1x64xf32> to vector<1x64xf32>
    %225 = vector.broadcast %224 : vector<1x64xf32> to vector<16x64xf32>
    %226 = arith.addf %222, %225 : vector<16x64xf32>
    %cst_85 = arith.constant 0.000000e+00 : f32
    %227 = vector.broadcast %cst_85 : f32 to vector<16x64xf32>
    %228 = arith.maximumf %226, %227 : vector<16x64xf32>
    %229 = arith.truncf %228 : vector<16x64xf32> to vector<16x64xbf16>
    %c1_86 = arith.constant 1 : index
    %c0_87 = arith.constant 0 : index
    %c0_88 = arith.constant 0 : index
    %230 = vector.load %arg10[%c1_86, %c0_87, %c0_88] : memref<2x64x32xbf16, #tpu.memory_space<vmem>>, vector<1x64x32xbf16>
    %231 = vector.shape_cast %230 : vector<1x64x32xbf16> to vector<64x32xbf16>
    %cst_89 = arith.constant dense<0.000000e+00> : vector<16x32xf32>
    %232 = tpu.matmul %229, %231, %cst_89 {dimension_numbers = #tpu.dot_dimension_numbers<[1], [0], [0], [1], [0, 0, 1, 1], [], []>} : vector<16x64xbf16>, vector<64x32xbf16>, vector<16x32xf32> -> vector<16x32xf32>
    %c1_90 = arith.constant 1 : index
    %c0_91 = arith.constant 0 : index
    %c0_92 = arith.constant 0 : index
    %233 = vector.load %arg11[%c1_90, %c0_91, %c0_92] : memref<2x1x32xf32, #tpu.memory_space<vmem>>, vector<1x1x32xf32>
    %234 = vector.shape_cast %233 : vector<1x1x32xf32> to vector<1x32xf32>
    %235 = vector.broadcast %234 : vector<1x32xf32> to vector<16x32xf32>
    %236 = arith.addf %232, %235 : vector<16x32xf32>
    %237 = arith.addf %194, %236 : vector<16x32xf32>
    %c0_93 = arith.constant 0 : index
    %c0_94 = arith.constant 0 : index
    %238 = vector.load %arg12[%c0_93, %c0_94] : memref<2x32xf32, #tpu.memory_space<vmem>>, vector<2x32xf32>
    %239 = vector.extract_strided_slice %238 {offsets = [0, 0], sizes = [1, 32], strides = [1, 1]} : vector<2x32xf32> to vector<1x32xf32>
    %240 = vector.extract_strided_slice %238 {offsets = [1, 0], sizes = [1, 32], strides = [1, 1]} : vector<2x32xf32> to vector<1x32xf32>
    %cst_95 = arith.constant dense<0.000000e+00> : vector<16xf32>
    %241 = vector.multi_reduction <add>, %237, %cst_95 [1] : vector<16x32xf32> to vector<16xf32>
    %242 = vector.shape_cast %241 : vector<16xf32> to vector<16x1xf32>
    %cst_96 = arith.constant 3.200000e+01 : f32
    %243 = vector.broadcast %cst_96 : f32 to vector<16x1xf32>
    %244 = arith.divf %242, %243 : vector<16x1xf32>
    %245 = vector.broadcast %244 : vector<16x1xf32> to vector<16x32xf32>
    %246 = arith.subf %237, %245 : vector<16x32xf32>
    %247 = arith.mulf %246, %246 : vector<16x32xf32>
    %cst_97 = arith.constant dense<0.000000e+00> : vector<16xf32>
    %248 = vector.multi_reduction <add>, %247, %cst_97 [1] : vector<16x32xf32> to vector<16xf32>
    %249 = vector.shape_cast %248 : vector<16xf32> to vector<16x1xf32>
    %cst_98 = arith.constant 3.200000e+01 : f32
    %250 = vector.broadcast %cst_98 : f32 to vector<16x1xf32>
    %251 = arith.divf %249, %250 : vector<16x1xf32>
    %252 = vector.broadcast %244 : vector<16x1xf32> to vector<16x32xf32>
    %253 = arith.subf %237, %252 : vector<16x32xf32>
    %cst_99 = arith.constant 9.99999974E-6 : f32
    %254 = vector.broadcast %cst_99 : f32 to vector<16x1xf32>
    %255 = arith.addf %251, %254 : vector<16x1xf32>
    %256 = math.rsqrt %255 : vector<16x1xf32>
    %257 = vector.broadcast %256 : vector<16x1xf32> to vector<16x32xf32>
    %258 = arith.mulf %253, %257 : vector<16x32xf32>
    %259 = vector.broadcast %239 : vector<1x32xf32> to vector<16x32xf32>
    %260 = arith.mulf %258, %259 : vector<16x32xf32>
    %261 = vector.broadcast %240 : vector<1x32xf32> to vector<16x32xf32>
    %262 = arith.addf %260, %261 : vector<16x32xf32>
    %c0_100 = arith.constant 0 : index
    %c0_101 = arith.constant 0 : index
    %263 = vector.load %arg13[%c0_100, %c0_101] : memref<16x32xf32, #tpu.memory_space<vmem>>, vector<16x32xf32>
    tpu.vector_store %arg13[%c0_100, %c0_101], %262 {strides = array<i32>} : memref<16x32xf32, #tpu.memory_space<vmem>>, vector<16x32xf32>,
    return
  }
  func.func @transform_0(%arg0: i32) -> (i32, i32) {
    %c0_i32 = arith.constant 0 : i32
    %c0_i32_0 = arith.constant 0 : i32
    %c0_i32_1 = arith.constant 0 : i32
    return %c0_i32, %c0_i32_0 : i32, i32
  }
  func.func @transform_1(%arg0: i32) -> (i32, i32) {
    %c0_i32 = arith.constant 0 : i32
    %c0_i32_0 = arith.constant 0 : i32
    %c0_i32_1 = arith.constant 0 : i32
    return %c0_i32, %c0_i32_0 : i32, i32
  }
  func.func @transform_2(%arg0: i32) -> (i32, i32, i32) {
    %c0_i32 = arith.constant 0 : i32
    %c0_i32_0 = arith.constant 0 : i32
    %c0_i32_1 = arith.constant 0 : i32
    %c0_i32_2 = arith.constant 0 : i32
    return %c0_i32, %c0_i32_0, %c0_i32_1 : i32, i32, i32
  }
  func.func @transform_3(%arg0: i32) -> (i32, i32, i32) {
    %c0_i32 = arith.constant 0 : i32
    %c0_i32_0 = arith.constant 0 : i32
    %c0_i32_1 = arith.constant 0 : i32
    %c0_i32_2 = arith.constant 0 : i32
    return %c0_i32, %c0_i32_0, %c0_i32_1 : i32, i32, i32
  }
  func.func @transform_4(%arg0: i32) -> (i32, i32, i32) {
    %c0_i32 = arith.constant 0 : i32
    %c0_i32_0 = arith.constant 0 : i32
    %c0_i32_1 = arith.constant 0 : i32
    %c0_i32_2 = arith.constant 0 : i32
    return %c0_i32, %c0_i32_0, %c0_i32_1 : i32, i32, i32
  }
  func.func @transform_5(%arg0: i32) -> (i32, i32, i32) {
    %c0_i32 = arith.constant 0 : i32
    %c0_i32_0 = arith.constant 0 : i32
    %c0_i32_1 = arith.constant 0 : i32
    %c0_i32_2 = arith.constant 0 : i32
    return %c0_i32, %c0_i32_0, %c0_i32_1 : i32, i32, i32
  }
  func.func @transform_6(%arg0: i32) -> (i32, i32, i32) {
    %c0_i32 = arith.constant 0 : i32
    %c0_i32_0 = arith.constant 0 : i32
    %c0_i32_1 = arith.constant 0 : i32
    %c0_i32_2 = arith.constant 0 : i32
    return %c0_i32, %c0_i32_0, %c0_i32_1 : i32, i32, i32
  }
  func.func @transform_7(%arg0: i32) -> (i32, i32, i32) {
    %c0_i32 = arith.constant 0 : i32
    %c0_i32_0 = arith.constant 0 : i32
    %c0_i32_1 = arith.constant 0 : i32
    %c0_i32_2 = arith.constant 0 : i32
    return %c0_i32, %c0_i32_0, %c0_i32_1 : i32, i32, i32
  }
  func.func @transform_8(%arg0: i32) -> (i32, i32, i32) {
    %c0_i32 = arith.constant 0 : i32
    %c0_i32_0 = arith.constant 0 : i32
    %c0_i32_1 = arith.constant 0 : i32
    %c0_i32_2 = arith.constant 0 : i32
    return %c0_i32, %c0_i32_0, %c0_i32_1 : i32, i32, i32
  }
  func.func @transform_9(%arg0: i32) -> (i32, i32, i32) {
    %c0_i32 = arith.constant 0 : i32
    %c0_i32_0 = arith.constant 0 : i32
    %c0_i32_1 = arith.constant 0 : i32
    %c0_i32_2 = arith.constant 0 : i32
    return %c0_i32, %c0_i32_0, %c0_i32_1 : i32, i32, i32
  }
  func.func @transform_10(%arg0: i32) -> (i32, i32, i32) {
    %c0_i32 = arith.constant 0 : i32
    %c0_i32_0 = arith.constant 0 : i32
    %c0_i32_1 = arith.constant 0 : i32
    %c0_i32_2 = arith.constant 0 : i32
    return %c0_i32, %c0_i32_0, %c0_i32_1 : i32, i32, i32
  }
  func.func @transform_11(%arg0: i32) -> (i32, i32) {
    %c0_i32 = arith.constant 0 : i32
    %c0_i32_0 = arith.constant 0 : i32
    %c0_i32_1 = arith.constant 0 : i32
    return %c0_i32, %c0_i32_0 : i32, i32
  }
  func.func @transform_12(%arg0: i32) -> (i32, i32) {
    %c0_i32 = arith.constant 0 : i32
    %c0_i32_0 = arith.constant 0 : i32
    %c0_i32_1 = arith.constant 0 : i32
    return %c0_i32, %c0_i32_0 : i32, i32
  }
}

</mosaic_0001>

<bundles_post_ra>
// kernel: encoder_forward.1
= control target key start
LH: loop header
LB: loop body
LE: loop exit
PB: predicated region body
PF: predicated region fallthrough
CT: control target
= control target key end

     0   :  { %vm54_vm0 = vcmask 261120   ;;  %s5214_s0 = inlined_call_operand.vmem [shape: f32[16,32], index: 0, kind: input, shape index: {}]   ;;  %s5215_s1 = inlined_call_operand.vmem [shape: f32[64,64], index: 1, kind: input, shape index: {}]   ;;  %s5216_s2 = inlined_call_operand.vmem [shape: f32[2,4,32], index: 2, kind: input, shape index: {}]   ;;  %s5217_s3 = inlined_call_operand.vmem [shape: bf16[2,32,96], index: 3, kind: input, shape index: {}]   ;;  %s5218_s4 = inlined_call_operand.vmem [shape: f32[2,1,96], index: 4, kind: input, shape index: {}]   ;;  %s5219_s5 = inlined_call_operand.vmem [shape: bf16[2,32,32], index: 5, kind: input, shape index: {}]   ;;  %s5220_s6 = inlined_call_operand.vmem [shape: f32[2,1,32], index: 6, kind: input, shape index: {}]   ;;  %s5221_s7 = inlined_call_operand.vmem [shape: bf16[2,32,64], index: 7, kind: input, shape index: {}]   ;;  %s5222_s8 = inlined_call_operand.vmem [shape: f32[2,1,64], index: 8, kind: input, shape index: {}]   ;;  %s5223_s9 = inlined_call_operand.vmem [shape: bf16[2,64,32], index: 9, kind: input, shape index: {}]   ;;  %s5224_s10 = inlined_call_operand.vmem [shape: f32[2,1,32], index: 10, kind: input, shape index: {}]   ;;  %s5225_s11 = inlined_call_operand.vmem [shape: f32[2,32], index: 11, kind: input, shape index: {}]   ;;  %s5226_s12 = inlined_call_operand.hbm [shape: f32[16,32], index: 12, kind: output, shape index: {}]  }
   0x1   :  { %v43_v0 = vld [vmem:[%s5214_s0] sm:$0xff]  ;;  %v44_v1 = vld [vmem:[%s5214_s0 + $0x8] sm:$0xff] }
   0x2   :  { %v55_v2 = vsel %vm54_vm0, %v43_v0, 0.0  ;;  %v58_v3 = vsel %vm54_vm0, %v44_v1, 0.0 }
   0x3   :  { %56 = vadd.xlane.f32.xlu0 %v55_v2 }
   0x7   :  { %59 = vadd.xlane.f32.xlu0 %v58_v3 }
   0x8   :  { %17 = vsyncpa [#allocation3], 0  ;;  %v4136_v14 = vld [vmem:[%s5217_s3 + $0x8] sm:$0xff]   ;;  %v4274_v15 = vmov 0.0   ;;  %vm4275_vm1 = vmmov 0   ;;  %v4137_v16 = vld [vmem:[%s5217_s3] sm:$0xff]   ;;  %v82_v23 = vlaneseq }
   0x9   :  { %3948 = vmatprep.subr.bf16.mxu0 %v4274_v15  ;;  %3952 = vmatprep.mubr.msk.bf16.mxu0 %vm4275_vm1, %v4274_v15  ;;  %v53_v26 = vld [vmem:[%s5216_s2] sm:$0xf]  ;;  %s4276_s15 = smov 112   ;;  %s4277_s16 = smov 120   ;;  %v4280_v46 = vmov 1983009808  }
   0xa   :  { %3949 = vmatpush3.bf16.msra.mxu0 %v4136_v14  ;;  %v4373_v24 = vshrl.u32 %v82_v23, 7  ;;  %v3779_v39 = vld [vmem:[%s5218_s4] ss:$0 sm:$0xff]  ;;  %s4278_s17 = smov 104   ;;  %s4279_s18 = smov 96   ;;  %v185_v47 = vunpack.c.l.s4 %v4280_v46  ;;  %vm1054_vm2 = vcmask 64512  }
   0xb   :  { %3950 = vmatprep.subr.bf16.mxu0 %v4274_v15  ;;  %v4281_v48 = vmov 1934713408   ;;  %vm1144_vm3 = vcmask 523264   ;;  %s4282_s21 = smov 64   ;;  %s4283_s26 = smov 16   ;;  %vm1616_vm4 = vcmask 130048  }
   0xc   :  { %v4376_v25 = vsub.s32 0, %v4373_v24  ;;  %v4383_v30 = vsub.s32 1, %v4373_v24  ;;  %v217_v49 = vunpack.c.l.s4 %v4281_v48  ;;  %v186_v50 = vunpack.c.0.s8 %v185_v47  ;;  %s4284_s27 = smov 8   ;;  %s4285_s28 = smov 24  }
   0xd   :  { %vm1619_vm5 = vcmask 195584  }
   0xe   :  { %3951 = vmatpush3.bf16.msra.mxu0 %v4137_v16  ;;  %v85_v29 = vrot.slane %v53_v26, %v4376_v25  ;;  %v91_v34 = vrot.slane %v53_v26, %v4383_v30  ;;  %v218_v53 = vunpack.c.0.s8 %v217_v49  ;;  %v4417_v54 = vsub.s32 %v186_v50, %v4373_v24 }
  0x10   :  { %v4436_v61 = vsub.s32 %v218_v53, %v4373_v24 }
  0x8c   :  { %v57_v4 = vpop.xlane.xlu0 %56 }
  0x8d   :  { %v62_v5 = vmul.f32 0.03125, %v57_v4 }
  0x8f   :  { %v64_v6 = vsub.f32 %v43_v0, %v62_v5 }
  0x90   :  { %v60_v7 = vpop.xlane.xlu0 %59 }
  0x91   :  { %v63_v8 = vmul.f32 0.03125, %v60_v7  ;;  %v66_v9 = vmul.f32 %v64_v6, %v64_v6 }
  0x93   :  { %v65_v10 = vsub.f32 %v44_v1, %v63_v8  ;;  %v68_v11 = vsel %vm54_vm0, %v66_v9, 0.0 }
  0x94   :  { %69 = vadd.xlane.f32.xlu1 %v68_v11 }
  0x95   :  { %v67_v12 = vmul.f32 %v65_v10, %v65_v10 }
  0x97   :  { %v71_v13 = vsel %vm54_vm0, %v67_v12, 0.0 }
  0x98   :  { %72 = vadd.xlane.f32.xlu1 %v71_v13 }
 0x11d   :  { %v70_v17 = vpop.xlane.xlu1 %69 }
 0x11e   :  { %v74_v18 = vmul.f32 0.03125, %v70_v17 }
 0x120   :  { %v76_v19 = vadd.f32 1e-05, %v74_v18 }
 0x121   :  { %v73_v20 = vpop.xlane.xlu1 %72 }
 0x122   :  { %4156 = vrsqrt.f32 %v76_v19  ;;  %v75_v21 = vmul.f32 0.03125, %v73_v20 }
 0x124   :  { %v77_v22 = vadd.f32 1e-05, %v75_v21 }
 0x126   :  { %4158 = vrsqrt.f32 %v77_v22 }
 0x12f   :  { %v4157_v27 = vpop.eup %4156 }
 0x130   :  { %v80_v28 = vmul.f32 %v4157_v27, %v64_v6 }
 0x132   :  { %v86_v33 = vmul.f32 %v85_v29, %v80_v28 }
 0x133   :  { %v4159_v31 = vpop.eup %4158 }
 0x134   :  { %v81_v32 = vmul.f32 %v4159_v31, %v65_v10  ;;  %v92_v36 = vadd.f32 %v91_v34, %v86_v33 }
 0x136   :  { %v87_v35 = vmul.f32 %v85_v29, %v81_v32 }
 0x138   :  { %v93_v37 = vadd.f32 %v91_v34, %v87_v35 }
 0x13a   :  { %v94_v38 = vpack.c.bf16 %v93_v37, %v92_v36 }
 0x13c   :  { %3953 = vmatmul.mubr.msk.bf16.vlgmr.msra.gmra.mxu0 %vm54_vm0, %v94_v38 }
 0x1fc   :  { %v155_v40 = vpop.f32.mrf.mxu0 }
 0x1fd   :  { %v4390_v41 = vadd.f32 %v3779_v39, %v155_v40 }
 0x1fe   :  { %v3954_v42 = vpop.f32.mrf.mxu0 }
 0x1ff   :  { %170 = vrot.lane.b32.xlu1 %v4390_v41, %s4276_s15  ;;  %164 = vrot.lane.b32.xlu0 %v4390_v41, %s4277_s16 }
 0x200   :  { %v158_v43 = vpop.f32.mrf.mxu0 }
 0x201   :  { %v4396_v44 = vadd.f32 %v3779_v39, %v158_v43 }
 0x202   :  { %v3955_v45 = vpop.f32.mrf.mxu0 }
 0x203   :  { %176 = vrot.lane.b32.xlu0 %v4390_v41, %s4278_s17  ;;  %166 = vrot.lane.b32.xlu1 %v4396_v44, %s4277_s16 }
 0x207   :  { %454 = vrot.lane.b32.xlu0 %v4390_v41, %s4279_s18  ;;  %172 = vrot.lane.b32.xlu1 %v4396_v44, %s4276_s15 }
 0x20b   :  { %178 = vrot.lane.b32.xlu1 %v4396_v44, %s4278_s17 }
 0x20f   :  { %456 = vrot.lane.b32.xlu1 %v4396_v44, %s4279_s18 }
 0x271   :  { %v4410_v51 = vpop.permute.xlu1 %170  ;;  %v4412_v52 = vpop.permute.xlu0 %164 }
 0x272   :  { %458 = vrot.lane.b32.xlu0 %v4412_v52, %s4279_s18  ;;  %v182_v55 = vcombine.low %v4390_v41, %v4410_v51  ;;  %v183_v56 = vcombine.high %v4390_v41, %v4410_v51 }
 0x274   :  { %v190_v62 = vrot.slane %v182_v55, %v4417_v54  ;;  %v197_v63 = vrot.slane %v183_v56, %v4417_v54 }
 0x275   :  { %v4423_v57 = vpop.permute.xlu0 %176  ;;  %v4425_v58 = vpop.permute.xlu1 %166 }
 0x276   :  { %v198_v59 = vcombine.low %v4412_v52, %v4423_v57  ;;  %v199_v60 = vcombine.high %v4412_v52, %v4423_v57  ;;  %462 = vrot.lane.b32.xlu0 %v4410_v51, %s4279_s18  ;;  %460 = vrot.lane.b32.xlu1 %v4425_v58, %s4279_s18 }
 0x278   :  { %v206_v0 = vrot.slane %v198_v59, %v4417_v54  ;;  %v213_v1 = vrot.slane %v199_v60, %v4417_v54 }
 0x279   :  { %v4442_v2 = vpop.permute.xlu1 %172 }
 0x27a   :  { %v214_v3 = vcombine.low %v190_v62, %v206_v0  ;;  %v215_v4 = vcombine.high %v190_v62, %v206_v0  ;;  %v230_v5 = vcombine.low %v197_v63, %v213_v1  ;;  %v231_v6 = vcombine.high %v197_v63, %v213_v1  ;;  %466 = vrot.lane.b32.xlu0 %v4423_v57, %s4279_s18 }
 0x27b   :  { %v250_v7 = vcombine.low %v4396_v44, %v4442_v2  ;;  %v251_v8 = vcombine.high %v4396_v44, %v4442_v2  ;;  %464 = vrot.lane.b32.xlu1 %v4442_v2, %s4279_s18 }
 0x27c   :  { %v222_v9 = vrot.slane %v214_v3, %v4436_v61  ;;  %v229_v10 = vrot.slane %v215_v4, %v4436_v61  ;;  %v238_v11 = vrot.slane %v230_v5, %v4436_v61  ;;  %v245_v12 = vrot.slane %v231_v6, %v4436_v61 }
 0x27d   :  { %v4456_v13 = vpop.permute.xlu1 %178  ;;  %v258_v19 = vrot.slane %v250_v7, %v4417_v54  ;;  %v265_v20 = vrot.slane %v251_v8, %v4417_v54 }
 0x27e   :  { %v266_v14 = vcombine.low %v4425_v58, %v4456_v13  ;;  %v267_v16 = vcombine.high %v4425_v58, %v4456_v13  ;;  %v318_v17 = vcombine.low %v222_v9, %v229_v10  ;;  %v3783_v18 = vcombine.high %v222_v9, %v229_v10 }
 0x27f   :  { %468 = vrot.lane.b32.xlu1 %v4456_v13, %s4279_s18  ;;  %v334_v21 = vcombine.low %v238_v11, %v245_v12  ;;  %v3784_v22 = vcombine.high %v238_v11, %v245_v12 }
 0x280   :  { %v274_v23 = vrot.slane %v266_v14, %v4417_v54  ;;  %v281_v26 = vrot.slane %v267_v16, %v4417_v54  ;;  %v325_v27 = vrot.slane %v318_v17, %v4417_v54  ;;  %v333_v28 = vrot.slane %v3783_v18, %v4417_v54 }
 0x281   :  { %v341_v29 = vrot.slane %v334_v21, %v4417_v54  ;;  %v349_v31 = vrot.slane %v3784_v22, %v4417_v54 }
 0x282   :  { %v282_v32 = vcombine.low %v258_v19, %v274_v23  ;;  %v283_v33 = vcombine.high %v258_v19, %v274_v23  ;;  %v298_v34 = vcombine.low %v265_v20, %v281_v26  ;;  %v299_v35 = vcombine.high %v265_v20, %v281_v26  ;;  %v455_v23 = vpop.permute.xlu0 %454  ;;  %v457_v26 = vpop.permute.xlu1 %456 }
 0x283   :  { %v350_v36 = vcombine.low %v325_v27, %v333_v28  ;;  %v351_v37 = vcombine.high %v325_v27, %v333_v28  ;;  %v366_v38 = vcombine.low %v341_v29, %v349_v31  ;;  %v367_v39 = vcombine.high %v341_v29, %v349_v31 }
 0x284   :  { %v290_v40 = vrot.slane %v282_v32, %v4436_v61  ;;  %v297_v42 = vrot.slane %v283_v33, %v4436_v61  ;;  %v306_v43 = vrot.slane %v298_v34, %v4436_v61  ;;  %v313_v45 = vrot.slane %v299_v35, %v4436_v61 }
 0x285   :  { %v358_v46 = vrot.slane %v350_v36, %v4436_v61  ;;  %v374_v47 = vrot.slane %v366_v38, %v4436_v61  ;;  %v365_v48 = vrot.slane %v351_v37, %v4436_v61  ;;  %v381_v49 = vrot.slane %v367_v39, %v4436_v61 }
 0x286   :  { %v386_v50 = vcombine.low %v290_v40, %v297_v42  ;;  %v3785_v53 = vcombine.high %v290_v40, %v297_v42  ;;  %v402_v55 = vcombine.low %v306_v43, %v313_v45  ;;  %v3786_v56 = vcombine.high %v306_v43, %v313_v45 }
 0x287   :  { %v383_v59 = vcombine.high %v358_v46, %v374_v47  ;;  %v384_v60 = vcombine.low %v365_v48, %v381_v49  ;;  %v385_v62 = vcombine.high %v365_v48, %v381_v49  ;;  %v382_v12 = vcombine.low %v358_v46, %v374_v47 }
 0x288   :  { %v393_v63 = vrot.slane %v386_v50, %v4417_v54  ;;  %v401_v0 = vrot.slane %v3785_v53, %v4417_v54  ;;  %v409_v1 = vrot.slane %v402_v55, %v4417_v54  ;;  %v417_v3 = vrot.slane %v3786_v56, %v4417_v54 }
 0x28a   :  { %v418_v4 = vcombine.low %v393_v63, %v401_v0  ;;  %v419_v5 = vcombine.high %v393_v63, %v401_v0  ;;  %v434_v6 = vcombine.low %v409_v1, %v417_v3  ;;  %v435_v7 = vcombine.high %v409_v1, %v417_v3 }
 0x28c   :  { %v426_v8 = vrot.slane %v418_v4, %v4436_v61  ;;  %v442_v9 = vrot.slane %v434_v6, %v4436_v61  ;;  %v433_v10 = vrot.slane %v419_v5, %v4436_v61  ;;  %v449_v11 = vrot.slane %v435_v7, %v4436_v61 }
 0x28e   :  { %v450_v14 = vcombine.low %v426_v8, %v442_v9  ;;  %v451_v16 = vcombine.high %v426_v8, %v442_v9  ;;  %v452_v17 = vcombine.low %v433_v10, %v449_v11  ;;  %v453_v18 = vcombine.high %v433_v10, %v449_v11 }
 0x290   :  { %v1046_v19 = vpack.c.bf16 %v450_v14, %v382_v12  ;;  %v4488_v20 = vpack.c.bf16 %v451_v16, %v383_v59  ;;  %v4490_v21 = vpack.c.bf16 %v452_v17, %v384_v60  ;;  %v4492_v22 = vpack.c.bf16 %v453_v18, %v385_v62 }
 0x292   :  { %3964 = vmatprep.mubr.msk.bf16.mxu1 %vm1054_vm2, %v1046_v19 }
 0x2e4   :  { %v459_v27 = vpop.permute.xlu0 %458 }
 0x2e8   :  { %v463_v28 = vpop.permute.xlu0 %462  ;;  %v461_v29 = vpop.permute.xlu1 %460 }
 0x2e9   :  { %v478_v31 = vcombine.low %v455_v23, %v463_v28  ;;  %v479_v32 = vcombine.high %v455_v23, %v463_v28 }
 0x2eb   :  { %v486_v37 = vrot.slane %v478_v31, %v4417_v54  ;;  %v493_v38 = vrot.slane %v479_v32, %v4417_v54 }
 0x2ec   :  { %v467_v33 = vpop.permute.xlu0 %466 }
 0x2ed   :  { %v494_v34 = vcombine.low %v459_v27, %v467_v33  ;;  %v495_v35 = vcombine.high %v459_v27, %v467_v33  ;;  %v465_v36 = vpop.permute.xlu1 %464 }
 0x2ee   :  { %v546_v42 = vcombine.low %v457_v26, %v465_v36  ;;  %v547_v43 = vcombine.high %v457_v26, %v465_v36 }
 0x2ef   :  { %v502_v39 = vrot.slane %v494_v34, %v4417_v54  ;;  %v509_v40 = vrot.slane %v495_v35, %v4417_v54 }
 0x2f0   :  { %v554_v62 = vrot.slane %v546_v42, %v4417_v54  ;;  %v561_v63 = vrot.slane %v547_v43, %v4417_v54 }
 0x2f1   :  { %v510_v45 = vcombine.low %v486_v37, %v502_v39  ;;  %v511_v46 = vcombine.high %v486_v37, %v502_v39  ;;  %v526_v47 = vcombine.low %v493_v38, %v509_v40  ;;  %v527_v48 = vcombine.high %v493_v38, %v509_v40  ;;  %v469_v49 = vpop.permute.xlu1 %468 }
 0x2f2   :  { %v562_v50 = vcombine.low %v461_v29, %v469_v49  ;;  %v563_v53 = vcombine.high %v461_v29, %v469_v49 }
 0x2f3   :  { %v518_v55 = vrot.slane %v510_v45, %v4436_v61  ;;  %v525_v56 = vrot.slane %v511_v46, %v4436_v61  ;;  %v534_v59 = vrot.slane %v526_v47, %v4436_v61  ;;  %v541_v60 = vrot.slane %v527_v48, %v4436_v61 }
 0x2f4   :  { %v570_v0 = vrot.slane %v562_v50, %v4417_v54  ;;  %v577_v1 = vrot.slane %v563_v53, %v4417_v54 }
 0x2f5   :  { %v614_v3 = vcombine.low %v518_v55, %v525_v56  ;;  %v3787_v4 = vcombine.high %v518_v55, %v525_v56  ;;  %v630_v5 = vcombine.low %v534_v59, %v541_v60  ;;  %v3788_v6 = vcombine.high %v534_v59, %v541_v60 }
 0x2f6   :  { %v578_v7 = vcombine.low %v554_v62, %v570_v0  ;;  %v579_v8 = vcombine.high %v554_v62, %v570_v0  ;;  %v594_v9 = vcombine.low %v561_v63, %v577_v1  ;;  %v595_v10 = vcombine.high %v561_v63, %v577_v1 }
 0x2f7   :  { %v621_v11 = vrot.slane %v614_v3, %v4417_v54  ;;  %v629_v12 = vrot.slane %v3787_v4, %v4417_v54  ;;  %v637_v14 = vrot.slane %v630_v5, %v4417_v54  ;;  %v645_v16 = vrot.slane %v3788_v6, %v4417_v54 }
 0x2f8   :  { %v586_v17 = vrot.slane %v578_v7, %v4436_v61  ;;  %v593_v18 = vrot.slane %v579_v8, %v4436_v61  ;;  %v602_v19 = vrot.slane %v594_v9, %v4436_v61  ;;  %v609_v23 = vrot.slane %v595_v10, %v4436_v61 }
 0x2f9   :  { %v647_v26 = vcombine.high %v621_v11, %v629_v12  ;;  %v663_v27 = vcombine.high %v637_v14, %v645_v16  ;;  %v646_v50 = vcombine.low %v621_v11, %v629_v12  ;;  %v662_v53 = vcombine.low %v637_v14, %v645_v16  ;;  %v45_v14 = vld [vmem:[%s5215_s1] sm:$0xff]  ;;  %v47_v16 = vld [vmem:[%s5215_s1 + $0x10] sm:$0xff] }
 0x2fa   :  { %v682_v28 = vcombine.low %v586_v17, %v593_v18  ;;  %v3789_v29 = vcombine.high %v586_v17, %v593_v18  ;;  %v698_v31 = vcombine.low %v602_v19, %v609_v23  ;;  %v3790_v32 = vcombine.high %v602_v19, %v609_v23  ;;  %v48_v23 = vld [vmem:[%s5215_s1 + $0x18] sm:$0xff] }
 0x2fb   :  { %v661_v37 = vrot.slane %v647_v26, %v4436_v61  ;;  %v677_v38 = vrot.slane %v663_v27, %v4436_v61  ;;  %v654_v0 = vrot.slane %v646_v50, %v4436_v61  ;;  %v670_v1 = vrot.slane %v662_v53, %v4436_v61 }
 0x2fc   :  { %v689_v33 = vrot.slane %v682_v28, %v4417_v54  ;;  %v697_v34 = vrot.slane %v3789_v29, %v4417_v54  ;;  %v705_v35 = vrot.slane %v698_v31, %v4417_v54  ;;  %v713_v36 = vrot.slane %v3790_v32, %v4417_v54 }
 0x2fd   :  { %v681_v45 = vcombine.high %v661_v37, %v677_v38  ;;  %v680_v55 = vcombine.low %v661_v37, %v677_v38  ;;  %v679_v4 = vcombine.high %v654_v0, %v670_v1  ;;  %v678_v8 = vcombine.low %v654_v0, %v670_v1 }
 0x2fe   :  { %v715_v39 = vcombine.high %v689_v33, %v697_v34  ;;  %v731_v40 = vcombine.high %v705_v35, %v713_v36  ;;  %v714_v46 = vcombine.low %v689_v33, %v697_v34  ;;  %v730_v47 = vcombine.low %v705_v35, %v713_v36  ;;  %v49_v34 = vld [vmem:[%s5215_s1 + $0x20] sm:$0xff]  ;;  %v50_v36 = vld [vmem:[%s5215_s1 + $0x28] sm:$0xff] }
 0x300   :  { %v729_v42 = vrot.slane %v715_v39, %v4436_v61  ;;  %v745_v43 = vrot.slane %v731_v40, %v4436_v61  ;;  %v722_v62 = vrot.slane %v714_v46, %v4436_v61  ;;  %v738_v63 = vrot.slane %v730_v47, %v4436_v61  ;;  %v51_v39 = vld [vmem:[%s5215_s1 + $0x30] sm:$0xff]  ;;  %v52_v40 = vld [vmem:[%s5215_s1 + $0x38] sm:$0xff] }
 0x302   :  { %v748_v48 = vcombine.low %v729_v42, %v745_v43  ;;  %v749_v49 = vcombine.high %v729_v42, %v745_v43  ;;  %v747_v3 = vcombine.high %v722_v62, %v738_v63  ;;  %v746_v7 = vcombine.low %v722_v62, %v738_v63 }
 0x304   :  { %v1053_v56 = vpack.c.bf16 %v749_v49, %v681_v45  ;;  %v1052_v60 = vpack.c.bf16 %v748_v48, %v680_v55  ;;  %v1051_v6 = vpack.c.bf16 %v747_v3, %v679_v4  ;;  %v1050_v10 = vpack.c.bf16 %v746_v7, %v678_v8 }
 0x306   :  { %4084 = vmatprep.subr.msk.bf16.mxu1 %vm1054_vm2, %v1053_v56  ;;  %v1077_v59 = vsel %vm1054_vm2, %v1053_v56, 0  ;;  %v1074_v5 = vsel %vm1054_vm2, %v1052_v60, 0  ;;  %v1071_v9 = vsel %vm1054_vm2, %v1051_v6, 0  ;;  %v1068_v11 = vsel %vm1054_vm2, %v1050_v10, 0 }
 0x307   :  { %3957 = vmatpush3.bf16.xpose.msra.mxu1 %v1077_v59 }
 0x308   :  { %4085 = vmatprep.subr.msk.bf16.mxu1 %vm1054_vm2, %v1052_v60 }
 0x30f   :  { %3959 = vmatpush3.bf16.xpose.msra.mxu1 %v1074_v5 }
 0x310   :  { %4086 = vmatprep.subr.msk.bf16.mxu1 %vm1054_vm2, %v1051_v6 }
 0x317   :  { %3961 = vmatpush3.bf16.xpose.msra.mxu1 %v1071_v9 }
 0x318   :  { %4087 = vmatprep.subr.msk.bf16.mxu1 %vm1054_vm2, %v1050_v10 }
 0x31f   :  { %3963 = vmatpush3.bf16.xpose.msra.mxu1 %v1068_v11 }
 0x320   :  { %4004 = vmatprep.subr.bf16.mxu1 %v4274_v15 }
 0x326   :  { %3965 = vmatmul.mubr.msk.bf16.vlgmr.msra.gmra.mxu1 %vm1054_vm2, %v4488_v20 }
 0x327   :  { %3968 = vmatprep.mubr.msk.bf16.mxu1 %vm1054_vm2, %v4490_v21  ;;  %v46_v21 = vld [vmem:[%s5215_s1 + $0x8] sm:$0xff] }
 0x32e   :  { %3969 = vmatmul.mubr.msk.bf16.gmra.mxu1 %vm1054_vm2, %v4492_v22 }
 0x32f   :  { %4012 = vmatprep.mubr.msk.bf16.mxu1 %vm4275_vm1, %v4274_v15 }
 0x3e6   :  { %v3966_v12 = vpop.f32.mrf.mxu1 }
 0x3e7   :  { %v1122_v22 = vadd.f32 %v3966_v12, %v47_v16 }
 0x3e8   :  { %v1113_v17 = vpop.f32.mrf.mxu1 }
 0x3e9   :  { %v1114_v20 = vadd.f32 %v1113_v17, %v45_v14  ;;  %v1151_v32 = vsel %vm1144_vm3, %v1122_v22, -inf }
 0x3ea   :  { %v3967_v18 = vpop.f32.mrf.mxu1 }
 0x3eb   :  { %v1145_v19 = vsel %vm1144_vm3, %v1114_v20, -inf  ;;  %v1125_v29 = vadd.f32 %v3967_v18, %v48_v23 }
 0x3ec   :  { %v1116_v26 = vpop.f32.mrf.mxu1  ;;  %1146 = vmax.xlane.f32.xlu0 %v1145_v19 }
 0x3ed   :  { %v1117_v27 = vadd.f32 %v1116_v26, %v46_v21  ;;  %v1154_v38 = vsel %vm1144_vm3, %v1125_v29, -inf }
 0x3ee   :  { %v3970_v28 = vpop.f32.mrf.mxu1 }
 0x3ef   :  { %v1148_v31 = vsel %vm1144_vm3, %v1117_v27, -inf  ;;  %v1138_v45 = vadd.f32 %v3970_v28, %v51_v39 }
 0x3f0   :  { %v1129_v33 = vpop.f32.mrf.mxu1  ;;  %1149 = vmax.xlane.f32.xlu1 %v1148_v31  ;;  %1152 = vmax.xlane.f32.xlu0 %v1151_v32 }
 0x3f1   :  { %v1130_v37 = vadd.f32 %v1129_v33, %v49_v34  ;;  %v1163_v50 = vsel %vm1144_vm3, %v1138_v45, -inf }
 0x3f2   :  { %v3971_v35 = vpop.f32.mrf.mxu1 }
 0x3f3   :  { %v1141_v46 = vadd.f32 %v3971_v35, %v52_v40  ;;  %v1157_v48 = vsel %vm1144_vm3, %v1130_v37, -inf }
 0x3f4   :  { %v1132_v42 = vpop.f32.mrf.mxu1  ;;  %1155 = vmax.xlane.f32.xlu0 %v1154_v38 }
 0x3f5   :  { %v1133_v43 = vadd.f32 %v1132_v42, %v50_v36  ;;  %v1166_v49 = vsel %vm1144_vm3, %v1141_v46, -inf }
 0x3f7   :  { %v1160_v47 = vsel %vm1144_vm3, %v1133_v43, -inf }
 0x3f8   :  { %1161 = vmax.xlane.f32.xlu1 %v1160_v47  ;;  %1158 = vmax.xlane.f32.xlu0 %v1157_v48 }
 0x3fc   :  { %1167 = vmax.xlane.f32.xlu1 %v1166_v49  ;;  %1164 = vmax.xlane.f32.xlu0 %v1163_v50 }
 0x40d   :  { %752 = vrot.lane.b32.xlu1 %v4396_v44, %s4282_s21 }
 0x411   :  { %754 = vrot.lane.b32.xlu1 %v4412_v52, %s4282_s21 }
 0x412   :  { %750 = vrot.lane.b32.xlu0 %v4390_v41, %s4282_s21 }
 0x415   :  { %756 = vrot.lane.b32.xlu1 %v4425_v58, %s4282_s21 }
 0x416   :  { %758 = vrot.lane.b32.xlu0 %v4410_v51, %s4282_s21 }
 0x419   :  { %760 = vrot.lane.b32.xlu1 %v4442_v2, %s4282_s21 }
 0x41a   :  { %762 = vrot.lane.b32.xlu0 %v4423_v57, %s4282_s21 }
 0x41d   :  { %764 = vrot.lane.b32.xlu1 %v4456_v13, %s4282_s21 }
 0x475   :  { %v1147_v44 = vpop.xlane.xlu0 %1146 }
 0x476   :  { %v1169_v52 = vsub.f32 %v1114_v20, %v1147_v44 }
 0x478   :  { %v1177_v53 = vmul.f32 1.442695, %v1169_v52 }
 0x479   :  { %v1150_v55 = vpop.xlane.xlu1 %1149  ;;  %v1153_v41 = vpop.xlane.xlu0 %1152 }
 0x47a   :  { %4160 = vpow2.f32 %v1177_v53  ;;  %v1170_v56 = vsub.f32 %v1117_v27, %v1150_v55  ;;  %v1171_v58 = vsub.f32 %v1122_v22, %v1153_v41 }
 0x47c   :  { %v1179_v59 = vmul.f32 1.442695, %v1170_v56  ;;  %v1181_v60 = vmul.f32 1.442695, %v1171_v58 }
 0x47d   :  { %v1156_v51 = vpop.xlane.xlu0 %1155 }
 0x47e   :  { %4162 = vpow2.f32 %v1179_v59  ;;  %v1172_v62 = vsub.f32 %v1125_v29, %v1156_v51 }
 0x47f   :  { %4164 = vpow2.f32 %v1181_v60 }
 0x480   :  { %v1183_v2 = vmul.f32 1.442695, %v1172_v62 }
 0x481   :  { %v1162_v63 = vpop.xlane.xlu1 %1161  ;;  %v1159_v57 = vpop.xlane.xlu0 %1158 }
 0x482   :  { %4166 = vpow2.f32 %v1183_v2  ;;  %v1174_v0 = vsub.f32 %v1133_v43, %v1162_v63  ;;  %v1173_v13 = vsub.f32 %v1130_v37, %v1159_v57 }
 0x484   :  { %v1187_v1 = vmul.f32 1.442695, %v1174_v0  ;;  %v1185_v3 = vmul.f32 1.442695, %v1173_v13 }
 0x485   :  { %v1168_v4 = vpop.xlane.xlu1 %1167  ;;  %v1165_v5 = vpop.xlane.xlu0 %1164 }
 0x486   :  { %4168 = vpow2.f32 %v1187_v1  ;;  %v1176_v6 = vsub.f32 %v1141_v46, %v1168_v4  ;;  %v1175_v7 = vsub.f32 %v1138_v45, %v1165_v5 }
 0x487   :  { %v4592_v8 = vpop.eup %4160  ;;  %4170 = vpow2.f32 %v1185_v3 }
 0x488   :  { %v1191_v9 = vmul.f32 1.442695, %v1176_v6  ;;  %v1189_v10 = vmul.f32 1.442695, %v1175_v7  ;;  %v1193_v11 = vsel %vm1144_vm3, %v4592_v8, 0.0 }
 0x489   :  { %v753_v12 = vpop.permute.xlu1 %752  ;;  %1194 = vadd.xlane.f32.xlu0 %v1193_v11  ;;  %v751_v14 = vpop.permute.xlu0 %750 }
 0x48a   :  { %4172 = vpow2.f32 %v1191_v9 }
 0x48b   :  { %v4596_v16 = vpop.eup %4162  ;;  %4174 = vpow2.f32 %v1189_v10 }
 0x48c   :  { %v4598_v17 = vpop.eup %4164  ;;  %v1196_v20 = vsel %vm1144_vm3, %v4596_v16, 0.0 }
 0x48d   :  { %1197 = vadd.xlane.f32.xlu1 %v1196_v20  ;;  %v755_v18 = vpop.permute.xlu1 %754  ;;  %v1199_v21 = vsel %vm1144_vm3, %v4598_v17, 0.0  ;;  %v759_v22 = vpop.permute.xlu0 %758 }
 0x48e   :  { %1200 = vadd.xlane.f32.xlu0 %v1199_v21  ;;  %v774_v23 = vcombine.low %v751_v14, %v759_v22  ;;  %v775_v26 = vcombine.high %v751_v14, %v759_v22 }
 0x48f   :  { %v4604_v19 = vpop.eup %4166 }
 0x490   :  { %v1202_v27 = vsel %vm1144_vm3, %v4604_v19, 0.0  ;;  %v782_v34 = vrot.slane %v774_v23, %v4417_v54  ;;  %v789_v36 = vrot.slane %v775_v26, %v4417_v54 }
 0x491   :  { %v757_v28 = vpop.permute.xlu1 %756  ;;  %v763_v29 = vpop.permute.xlu0 %762 }
 0x492   :  { %1203 = vadd.xlane.f32.xlu0 %v1202_v27  ;;  %v790_v31 = vcombine.low %v755_v18, %v763_v29  ;;  %v791_v32 = vcombine.high %v755_v18, %v763_v29 }
 0x493   :  { %v4608_v33 = vpop.eup %4168 }
 0x494   :  { %v4611_v35 = vpop.eup %4170  ;;  %v798_v37 = vrot.slane %v790_v31, %v4417_v54  ;;  %v805_v38 = vrot.slane %v791_v32, %v4417_v54  ;;  %v1208_v39 = vsel %vm1144_vm3, %v4608_v33, 0.0 }
 0x495   :  { %1209 = vadd.xlane.f32.xlu1 %v1208_v39  ;;  %v761_v40 = vpop.permute.xlu1 %760  ;;  %v1205_v42 = vsel %vm1144_vm3, %v4611_v35, 0.0 }
 0x496   :  { %v806_v43 = vcombine.low %v782_v34, %v798_v37  ;;  %v807_v45 = vcombine.high %v782_v34, %v798_v37  ;;  %v822_v46 = vcombine.low %v789_v36, %v805_v38  ;;  %v823_v47 = vcombine.high %v789_v36, %v805_v38  ;;  %1206 = vadd.xlane.f32.xlu0 %v1205_v42 }
 0x497   :  { %v4620_v48 = vpop.eup %4172  ;;  %v842_v55 = vcombine.low %v753_v12, %v761_v40  ;;  %v843_v41 = vcombine.high %v753_v12, %v761_v40 }
 0x498   :  { %v4622_v49 = vpop.eup %4174  ;;  %v814_v50 = vrot.slane %v806_v43, %v4436_v61  ;;  %v821_v44 = vrot.slane %v807_v45, %v4436_v61  ;;  %v830_v52 = vrot.slane %v822_v46, %v4436_v61  ;;  %v837_v53 = vrot.slane %v823_v47, %v4436_v61 }
 0x499   :  { %v1214_v56 = vsel %vm1144_vm3, %v4620_v48, 0.0  ;;  %v765_v58 = vpop.permute.xlu1 %764  ;;  %v1211_v59 = vsel %vm1144_vm3, %v4622_v49, 0.0  ;;  %v850_v0 = vrot.slane %v842_v55, %v4417_v54  ;;  %v857_v13 = vrot.slane %v843_v41, %v4417_v54 }
 0x49a   :  { %v910_v60 = vcombine.low %v814_v50, %v821_v44  ;;  %v3791_v51 = vcombine.high %v814_v50, %v821_v44  ;;  %v926_v62 = vcombine.low %v830_v52, %v837_v53  ;;  %v3792_v2 = vcombine.high %v830_v52, %v837_v53  ;;  %1215 = vadd.xlane.f32.xlu1 %v1214_v56 }
 0x49b   :  { %v858_v63 = vcombine.low %v757_v28, %v765_v58  ;;  %v859_v57 = vcombine.high %v757_v28, %v765_v58  ;;  %1212 = vadd.xlane.f32.xlu0 %v1211_v59 }
 0x49c   :  { %v917_v4 = vrot.slane %v910_v60, %v4417_v54  ;;  %v925_v5 = vrot.slane %v3791_v51, %v4417_v54  ;;  %v933_v6 = vrot.slane %v926_v62, %v4417_v54  ;;  %v941_v7 = vrot.slane %v3792_v2, %v4417_v54 }
 0x49d   :  { %v866_v1 = vrot.slane %v858_v63, %v4417_v54  ;;  %v873_v3 = vrot.slane %v859_v57, %v4417_v54 }
 0x49e   :  { %v943_v22 = vcombine.high %v917_v4, %v925_v5  ;;  %v959_v23 = vcombine.high %v933_v6, %v941_v7  ;;  %v942_v47 = vcombine.low %v917_v4, %v925_v5  ;;  %v958_v50 = vcombine.low %v933_v6, %v941_v7 }
 0x49f   :  { %v874_v9 = vcombine.low %v850_v0, %v866_v1  ;;  %v875_v10 = vcombine.high %v850_v0, %v866_v1  ;;  %v890_v11 = vcombine.low %v857_v13, %v873_v3  ;;  %v891_v12 = vcombine.high %v857_v13, %v873_v3 }
 0x4a0   :  { %v957_v37 = vrot.slane %v943_v22, %v4436_v61  ;;  %v973_v38 = vrot.slane %v959_v23, %v4436_v61  ;;  %v950_v59 = vrot.slane %v942_v47, %v4436_v61  ;;  %v966_v60 = vrot.slane %v958_v50, %v4436_v61 }
 0x4a1   :  { %v882_v14 = vrot.slane %v874_v9, %v4436_v61  ;;  %v889_v20 = vrot.slane %v875_v10, %v4436_v61  ;;  %v898_v18 = vrot.slane %v890_v11, %v4436_v61  ;;  %v905_v21 = vrot.slane %v891_v12, %v4436_v61 }
 0x4a2   :  { %v977_v44 = vcombine.high %v957_v37, %v973_v38  ;;  %v976_v58 = vcombine.low %v957_v37, %v973_v38  ;;  %v975_v2 = vcombine.high %v950_v59, %v966_v60  ;;  %v974_v0 = vcombine.low %v950_v59, %v966_v60 }
 0x4a3   :  { %v978_v26 = vcombine.low %v882_v14, %v889_v20  ;;  %v3793_v27 = vcombine.high %v882_v14, %v889_v20  ;;  %v994_v28 = vcombine.low %v898_v18, %v905_v21  ;;  %v3794_v29 = vcombine.high %v898_v18, %v905_v21 }
 0x4a5   :  { %v985_v31 = vrot.slane %v978_v26, %v4417_v54  ;;  %v993_v32 = vrot.slane %v3793_v27, %v4417_v54  ;;  %v1001_v34 = vrot.slane %v994_v28, %v4417_v54  ;;  %v1009_v36 = vrot.slane %v3794_v29, %v4417_v54 }
 0x4a7   :  { %v1011_v39 = vcombine.high %v985_v31, %v993_v32  ;;  %v1027_v40 = vcombine.high %v1001_v34, %v1009_v36  ;;  %v1010_v42 = vcombine.low %v985_v31, %v993_v32  ;;  %v1026_v43 = vcombine.low %v1001_v34, %v1009_v36 }
 0x4a9   :  { %v1025_v45 = vrot.slane %v1011_v39, %v4436_v61  ;;  %v1041_v46 = vrot.slane %v1027_v40, %v4436_v61  ;;  %v1018_v55 = vrot.slane %v1010_v42, %v4436_v61  ;;  %v1034_v41 = vrot.slane %v1026_v43, %v4436_v61 }
 0x4ab   :  { %v1045_v52 = vcombine.high %v1025_v45, %v1041_v46  ;;  %v1044_v53 = vcombine.low %v1025_v45, %v1041_v46  ;;  %v1043_v62 = vcombine.high %v1018_v55, %v1034_v41  ;;  %v1042_v57 = vcombine.low %v1018_v55, %v1034_v41 }
 0x4ad   :  { %v1240_v56 = vpack.c.bf16 %v1045_v52, %v977_v44  ;;  %v1239_v51 = vpack.c.bf16 %v1044_v53, %v976_v58  ;;  %v1238_v63 = vpack.c.bf16 %v1043_v62, %v975_v2  ;;  %v1237_v13 = vpack.c.bf16 %v1042_v57, %v974_v0 }
 0x4af   :  { %3972 = vmatprep.subr.bf16.mxu0 %v1240_v56 }
 0x4b0   :  { %3973 = vmatpush3.bf16.msra.mxu0 %v1240_v56 }
 0x4b1   :  { %3974 = vmatprep.subr.bf16.mxu0 %v1239_v51 }
 0x4b4   :  { %3975 = vmatpush3.bf16.msra.mxu0 %v1239_v51 }
 0x4b5   :  { %3976 = vmatprep.subr.bf16.mxu0 %v1238_v63 }
 0x4b8   :  { %3977 = vmatpush3.bf16.msra.mxu0 %v1238_v63 }
 0x4b9   :  { %3978 = vmatprep.subr.bf16.mxu0 %v1237_v13 }
 0x4bc   :  { %3979 = vmatpush3.bf16.msra.mxu0 %v1237_v13 }
 0x4bd   :  { %3988 = vmatprep.subr.bf16.mxu0 %v4274_v15 }
 0x512   :  { %v1195_v1 = vpop.xlane.xlu0 %1194 }
 0x513   :  { %4176 = vrcp.f32 %v1195_v1 }
 0x516   :  { %v1198_v3 = vpop.xlane.xlu1 %1197 }
 0x517   :  { %4178 = vrcp.f32 %v1198_v3  ;;  %v1201_v4 = vpop.xlane.xlu0 %1200 }
 0x518   :  { %4180 = vrcp.f32 %v1201_v4 }
 0x51b   :  { %v1204_v5 = vpop.xlane.xlu0 %1203 }
 0x51c   :  { %4182 = vrcp.f32 %v1204_v5 }
 0x51e   :  { %v1210_v6 = vpop.xlane.xlu1 %1209 }
 0x51f   :  { %4184 = vrcp.f32 %v1210_v6  ;;  %v1207_v7 = vpop.xlane.xlu0 %1206 }
 0x520   :  { %4186 = vrcp.f32 %v1207_v7  ;;  %v4177_v9 = vpop.eup %4176 }
 0x521   :  { %v1225_v14 = vmul.f32 %v4177_v9, %v4592_v8 }
 0x523   :  { %v1216_v10 = vpop.xlane.xlu1 %1215 }
 0x524   :  { %v4179_v11 = vpop.eup %4178  ;;  %4188 = vrcp.f32 %v1216_v10  ;;  %v1213_v12 = vpop.xlane.xlu0 %1212 }
 0x525   :  { %4190 = vrcp.f32 %v1213_v12  ;;  %v1226_v20 = vmul.f32 %v4179_v11, %v4596_v16  ;;  %v4181_v18 = vpop.eup %4180 }
 0x526   :  { %v1227_v23 = vmul.f32 %v4181_v18, %v4598_v17 }
 0x527   :  { %v1233_v21 = vpack.c.bf16 %v1226_v20, %v1225_v14 }
 0x529   :  { %v4183_v22 = vpop.eup %4182  ;;  %3980 = vmatprep.mubr.msk.bf16.mxu0 %vm1144_vm3, %v1233_v21 }
 0x52a   :  { %v1228_v26 = vmul.f32 %v4183_v22, %v4604_v19  ;;  %v4138_v19 = vld [vmem:[%s5219_s5 + $0x8] sm:$0xff]  }
 0x52c   :  { %v4185_v27 = vpop.eup %4184  ;;  %v1234_v28 = vpack.c.bf16 %v1228_v26, %v1227_v23 }
 0x52d   :  { %v4187_v29 = vpop.eup %4186  ;;  %v1230_v31 = vmul.f32 %v4185_v27, %v4608_v33 }
 0x52e   :  { %3981 = vmatmul.mubr.msk.bf16.vlgmr.msra.gmra.mxu0 %vm1144_vm3, %v1234_v28  ;;  %v1229_v8 = vmul.f32 %v4187_v29, %v4611_v35 }
 0x52f   :  { %3989 = vmatpush3.bf16.msra.mxu0 %v4138_v19 }
 0x530   :  { %v1235_v32 = vpack.c.bf16 %v1230_v31, %v1229_v8  ;;  %3990 = vmatprep.subr.bf16.mxu0 %v4274_v15 }
 0x531   :  { %v4189_v16 = vpop.eup %4188 }
 0x532   :  { %v4191_v34 = vpop.eup %4190  ;;  %3984 = vmatprep.mubr.msk.bf16.mxu0 %vm1144_vm3, %v1235_v32  ;;  %v1232_v36 = vmul.f32 %v4189_v16, %v4620_v48 }
 0x533   :  { %v1231_v17 = vmul.f32 %v4191_v34, %v4622_v49 }
 0x535   :  { %v1236_v37 = vpack.c.bf16 %v1232_v36, %v1231_v17 }
 0x537   :  { %3985 = vmatmul.mubr.msk.bf16.gmra.mxu0 %vm1144_vm3, %v1236_v37 }
 0x538   :  { %3992 = vmatprep.mubr.msk.bf16.mxu0 %vm4275_vm1, %v4274_v15 }
 0x5ee   :  { %v3982_v33 = vpop.f32.mrf.mxu0 }
 0x5f0   :  { %v1287_v35 = vpop.f32.mrf.mxu0 }
 0x5f2   :  { %v3983_v38 = vpop.f32.mrf.mxu0 }
 0x5f4   :  { %v1290_v39 = vpop.f32.mrf.mxu0 }
 0x5f7   :  { %v3986_v48 = vpop.f32.mrf.mxu0 }
 0x5f8   :  { %v1334_v40 = vcombine.low %v3982_v33, %v3986_v48  ;;  %v1335_v49 = vcombine.high %v3982_v33, %v3986_v48  ;;  %v4139_v33 = vld [vmem:[%s5219_s5] sm:$0xff]  }
 0x5f9   :  { %v1303_v42 = vpop.f32.mrf.mxu0  ;;  %3991 = vmatpush3.bf16.msra.mxu0 %v4139_v33 }
 0x5fa   :  { %v1318_v43 = vcombine.low %v1287_v35, %v1303_v42  ;;  %v1319_v45 = vcombine.high %v1287_v35, %v1303_v42  ;;  %v1342_v47 = vrot.slane %v1334_v40, %v4417_v54  ;;  %v1349_v50 = vrot.slane %v1335_v49, %v4417_v54  ;;  %3996 = vmatprep.subr.bf16.mxu0 %v4274_v15 }
 0x5fb   :  { %v3987_v46 = vpop.f32.mrf.mxu0 }
 0x5fc   :  { %v1326_v44 = vrot.slane %v1318_v43, %v4417_v54  ;;  %v1333_v52 = vrot.slane %v1319_v45, %v4417_v54  ;;  %v1402_v53 = vcombine.low %v3983_v38, %v3987_v46  ;;  %v1403_v55 = vcombine.high %v3983_v38, %v3987_v46 }
 0x5fd   :  { %v1306_v41 = vpop.f32.mrf.mxu0 }
 0x5fe   :  { %v1350_v56 = vcombine.low %v1326_v44, %v1342_v47  ;;  %v1351_v58 = vcombine.high %v1326_v44, %v1342_v47  ;;  %v1366_v59 = vcombine.low %v1333_v52, %v1349_v50  ;;  %v1367_v60 = vcombine.high %v1333_v52, %v1349_v50 }
 0x5ff   :  { %v1386_v51 = vcombine.low %v1290_v39, %v1306_v41  ;;  %v1387_v62 = vcombine.high %v1290_v39, %v1306_v41  ;;  %v1410_v13 = vrot.slane %v1402_v53, %v4417_v54  ;;  %v1417_v1 = vrot.slane %v1403_v55, %v4417_v54 }
 0x600   :  { %v1358_v2 = vrot.slane %v1350_v56, %v4436_v61  ;;  %v1365_v63 = vrot.slane %v1351_v58, %v4436_v61  ;;  %v1374_v57 = vrot.slane %v1366_v59, %v4436_v61  ;;  %v1381_v0 = vrot.slane %v1367_v60, %v4436_v61 }
 0x601   :  { %v1394_v3 = vrot.slane %v1386_v51, %v4417_v54  ;;  %v1401_v4 = vrot.slane %v1387_v62, %v4417_v54 }
 0x602   :  { %v1454_v5 = vcombine.low %v1358_v2, %v1365_v63  ;;  %v3803_v6 = vcombine.high %v1358_v2, %v1365_v63  ;;  %v1470_v7 = vcombine.low %v1374_v57, %v1381_v0  ;;  %v3804_v9 = vcombine.high %v1374_v57, %v1381_v0 }
 0x603   :  { %v1418_v10 = vcombine.low %v1394_v3, %v1410_v13  ;;  %v1419_v11 = vcombine.high %v1394_v3, %v1410_v13  ;;  %v1434_v12 = vcombine.low %v1401_v4, %v1417_v1  ;;  %v1435_v14 = vcombine.high %v1401_v4, %v1417_v1 }
 0x604   :  { %v1461_v20 = vrot.slane %v1454_v5, %v4417_v54  ;;  %v1469_v18 = vrot.slane %v3803_v6, %v4417_v54  ;;  %v1477_v21 = vrot.slane %v1470_v7, %v4417_v54  ;;  %v1485_v22 = vrot.slane %v3804_v9, %v4417_v54 }
 0x605   :  { %v1426_v23 = vrot.slane %v1418_v10, %v4436_v61  ;;  %v1433_v26 = vrot.slane %v1419_v11, %v4436_v61  ;;  %v1442_v27 = vrot.slane %v1434_v12, %v4436_v61  ;;  %v1449_v28 = vrot.slane %v1435_v14, %v4436_v61 }
 0x606   :  { %v1487_v29 = vcombine.high %v1461_v20, %v1469_v18  ;;  %v1503_v31 = vcombine.high %v1477_v21, %v1485_v22  ;;  %v1486_v8 = vcombine.low %v1461_v20, %v1469_v18  ;;  %v1502_v32 = vcombine.low %v1477_v21, %v1485_v22  ;;  %v3807_v21 = vld [vmem:[%s5220_s6] ss:$0 sm:$0xff] }
 0x607   :  { %v1522_v16 = vcombine.low %v1426_v23, %v1433_v26  ;;  %v3805_v34 = vcombine.high %v1426_v23, %v1433_v26  ;;  %v1538_v36 = vcombine.low %v1442_v27, %v1449_v28  ;;  %v3806_v17 = vcombine.high %v1442_v27, %v1449_v28  ;;  %v4240_v27 = vld [vmem:[%s5214_s0] sm:$0xff] }
 0x608   :  { %v1494_v37 = vrot.slane %v1486_v8, %v4436_v61  ;;  %v1510_v19 = vrot.slane %v1502_v32, %v4436_v61  ;;  %v1501_v40 = vrot.slane %v1487_v29, %v4436_v61  ;;  %v1517_v49 = vrot.slane %v1503_v31, %v4436_v61 }
 0x609   :  { %v1529_v35 = vrot.slane %v1522_v16, %v4417_v54  ;;  %v1537_v38 = vrot.slane %v3805_v34, %v4417_v54  ;;  %v1545_v39 = vrot.slane %v1538_v36, %v4417_v54  ;;  %v1553_v48 = vrot.slane %v3806_v17, %v4417_v54  ;;  %v4241_v16 = vld [vmem:[%s5214_s0 + $0x8] sm:$0xff] }
 0x60a   :  { %v1518_v42 = vcombine.low %v1494_v37, %v1510_v19  ;;  %v1520_v55 = vcombine.low %v1501_v40, %v1517_v49  ;;  %v1519_v56 = vcombine.high %v1494_v37, %v1510_v19  ;;  %v1521_v2 = vcombine.high %v1501_v40, %v1517_v49 }
 0x60b   :  { %v1555_v43 = vcombine.high %v1529_v35, %v1537_v38  ;;  %v1571_v45 = vcombine.high %v1545_v39, %v1553_v48  ;;  %v1554_v46 = vcombine.low %v1529_v35, %v1537_v38  ;;  %v1570_v47 = vcombine.low %v1545_v39, %v1553_v48 }
 0x60d   :  { %v1569_v50 = vrot.slane %v1555_v43, %v4436_v61  ;;  %v1585_v44 = vrot.slane %v1571_v45, %v4436_v61  ;;  %v1562_v52 = vrot.slane %v1554_v46, %v4436_v61  ;;  %v1578_v53 = vrot.slane %v1570_v47, %v4436_v61  ;;  %v4141_v43 = vld [vmem:[%s5221_s7] sm:$0xff]   ;;  %v4142_v45 = vld [vmem:[%s5223_s9 + $0x18] sm:$0xff]   ;;  %v4143_v46 = vld [vmem:[%s5223_s9 + $0x10] sm:$0xff]  }
 0x60e   :  { %4005 = vmatpush3.bf16.msra.mxu1 %v4142_v45 }
 0x60f   :  { %v1588_v41 = vcombine.low %v1569_v50, %v1585_v44  ;;  %v1587_v58 = vcombine.high %v1562_v52, %v1578_v53  ;;  %v1586_v59 = vcombine.low %v1562_v52, %v1578_v53  ;;  %v1589_v62 = vcombine.high %v1569_v50, %v1585_v44  ;;  %4006 = vmatprep.subr.bf16.mxu1 %v4274_v15 }
 0x611   :  { %v4111_v60 = vpack.i.bf16 %v1588_v41, %v1520_v55  ;;  %v4106_v51 = vpack.i.bf16 %v1587_v58, %v1519_v56  ;;  %v4116_v63 = vpack.i.bf16 %v1589_v62, %v1521_v2  ;;  %v1720_v41 = vsub.s32 2, %v4373_v24 }
 0x612   :  { %4007 = vmatpush3.bf16.msra.mxu1 %v4143_v46 }
 0x613   :  { %4112 = vrot.lane.b32.xlu1 %v4111_v60, %s4283_s26  ;;  %4107 = vrot.lane.b32.xlu0 %v4106_v51, %s4284_s27  ;;  %v1726_v51 = vsub.s32 3, %v4373_v24  ;;  %v3869_v24 = vld [vmem:[%s5222_s8 + $0x1] ss:$0 sm:$0xff] }
 0x614   :  { %4008 = vmatprep.subr.bf16.mxu1 %v4274_v15 }
 0x617   :  { %4117 = vrot.lane.b32.xlu1 %v4116_v63, %s4285_s28 }
 0x685   :  { %v4113_v57 = vpop.permute.xlu1 %4112  ;;  %v4108_v0 = vpop.permute.xlu0 %4107 }
 0x686   :  { %v4110_v13 = vunpack.i.h.bf16 %v4108_v0  ;;  %v4109_v1 = vunpack.i.l.bf16 %v4108_v0  ;;  %v4115_v3 = vunpack.i.h.bf16 %v4113_v57  ;;  %v4114_v4 = vunpack.i.l.bf16 %v4113_v57 }
 0x688   :  { %v1614_v5 = vsel %vm1054_vm2, %v1518_v42, %v4109_v1  ;;  %v1615_v6 = vsel %vm1054_vm2, %v1586_v59, %v4110_v13  ;;  %v4140_v42 = vld [vmem:[%s5221_s7 + $0x8] sm:$0xff]   ;;  %v4242_v59 = vld [vmem:[%s5216_s2] sm:$0xf] }
 0x689   :  { %v4118_v7 = vpop.permute.xlu1 %4117  ;;  %v1617_v11 = vsel %vm1616_vm4, %v1614_v5, %v4114_v4  ;;  %v1618_v12 = vsel %vm1616_vm4, %v1615_v6, %v4115_v3  ;;  %v1721_v60 = vrot.slane %v4242_v59, %v1720_v41  ;;  %v1727_v57 = vrot.slane %v4242_v59, %v1726_v51  ;;  %v4144_v4 = vld [vmem:[%s5223_s9 + $0x8] sm:$0xff]   ;;  %v4145_v5 = vld [vmem:[%s5223_s9] sm:$0xff]  }
 0x68a   :  { %v4120_v9 = vunpack.i.h.bf16 %v4118_v7  ;;  %v4119_v10 = vunpack.i.l.bf16 %v4118_v7  ;;  %4009 = vmatpush3.bf16.msra.mxu1 %v4144_v4  ;;  %v3811_v6 = vld [vmem:[%s5222_s8] ss:$0 sm:$0xff] }
 0x68b   :  { %4010 = vmatprep.subr.bf16.mxu1 %v4274_v15 }
 0x68c   :  { %v1620_v14 = vsel %vm1619_vm5, %v1617_v11, %v4119_v10  ;;  %v1621_v20 = vsel %vm1619_vm5, %v1618_v12, %v4120_v9 }
 0x68d   :  { %v1622_v18 = vpack.c.bf16 %v1621_v20, %v1620_v14 }
 0x68e   :  { %4011 = vmatpush3.bf16.msra.mxu1 %v4145_v5 }
 0x68f   :  { %3993 = vmatmul.mubr.msk.bf16.vlgmr.msra.gmra.mxu0 %vm54_vm0, %v1622_v18 }
 0x690   :  { %4000 = vmatprep.mubr.msk.bf16.mxu0 %vm4275_vm1, %v4274_v15  ;;  %3997 = vmatpush3.bf16.msra.mxu0 %v4140_v42  ;;  %v4147_v42 = vld [vmem:[%s5217_s3 + $0x10] sm:$0xff]  }
 0x691   :  { %3998 = vmatprep.subr.bf16.mxu0 %v4274_v15 }
 0x694   :  { %3999 = vmatpush3.bf16.msra.mxu0 %v4141_v43 }
 0x695   :  { %4016 = vmatprep.subr.bf16.mxu0 %v4274_v15 }
 0x74f   :  { %v1683_v22 = vpop.f32.mrf.mxu0 }
 0x750   :  { %v1684_v23 = vadd.f32 %v3807_v21, %v1683_v22  ;;  %v3815_v22 = vld [vmem:[%s5224_s10] ss:$0 sm:$0xff] }
 0x751   :  { %v3994_v26 = vpop.f32.mrf.mxu0 }
 0x752   :  { %v4729_v28 = vadd.f32 %v4240_v27, %v1684_v23 }
 0x753   :  { %v1686_v29 = vpop.f32.mrf.mxu0 }
 0x754   :  { %v1687_v31 = vadd.f32 %v3807_v21, %v1686_v29  ;;  %v1692_v8 = vsel %vm54_vm0, %v4729_v28, 0.0 }
 0x755   :  { %1693 = vadd.xlane.f32.xlu1 %v1692_v8  ;;  %v3995_v32 = vpop.f32.mrf.mxu0 }
 0x756   :  { %v4736_v34 = vadd.f32 %v4241_v16, %v1687_v31 }
 0x758   :  { %v1695_v36 = vsel %vm54_vm0, %v4736_v34, 0.0 }
 0x759   :  { %1696 = vadd.xlane.f32.xlu0 %v1695_v36 }
 0x7de   :  { %v1694_v17 = vpop.xlane.xlu1 %1693 }
 0x7df   :  { %v1698_v37 = vmul.f32 0.03125, %v1694_v17 }
 0x7e1   :  { %v1700_v19 = vsub.f32 %v4729_v28, %v1698_v37 }
 0x7e2   :  { %v1697_v33 = vpop.xlane.xlu0 %1696 }
 0x7e3   :  { %v1699_v35 = vmul.f32 0.03125, %v1697_v33  ;;  %v1702_v38 = vmul.f32 %v1700_v19, %v1700_v19 }
 0x7e5   :  { %v1701_v39 = vsub.f32 %v4736_v34, %v1699_v35  ;;  %v1704_v48 = vsel %vm54_vm0, %v1702_v38, 0.0 }
 0x7e6   :  { %1705 = vadd.xlane.f32.xlu0 %v1704_v48 }
 0x7e7   :  { %v1703_v40 = vmul.f32 %v1701_v39, %v1701_v39 }
 0x7e9   :  { %v1707_v49 = vsel %vm54_vm0, %v1703_v40, 0.0 }
 0x7ea   :  { %1708 = vadd.xlane.f32.xlu0 %v1707_v49  ;;  %v4146_v49 = vld [vmem:[%s5217_s3 + $0x18] sm:$0xff]  }
 0x86f   :  { %v1706_v47 = vpop.xlane.xlu0 %1705 }
 0x870   :  { %v1710_v50 = vmul.f32 0.03125, %v1706_v47 }
 0x872   :  { %v1712_v44 = vadd.f32 1e-05, %v1710_v50 }
 0x873   :  { %v1709_v52 = vpop.xlane.xlu0 %1708 }
 0x874   :  { %4192 = vrsqrt.f32 %v1712_v44  ;;  %v1711_v53 = vmul.f32 0.03125, %v1709_v52  ;;  %v3821_v52 = vld [vmem:[%s5216_s2 + $0x4] sm:$0xf] }
 0x876   :  { %v1713_v55 = vadd.f32 1e-05, %v1711_v53 }
 0x878   :  { %4194 = vrsqrt.f32 %v1713_v55 }
 0x881   :  { %v4193_v56 = vpop.eup %4192 }
 0x882   :  { %v1716_v58 = vmul.f32 %v4193_v56, %v1700_v19  ;;  %v1917_v56 = vrot.slane %v3821_v52, %v4376_v25 }
 0x884   :  { %v1722_v63 = vmul.f32 %v1721_v60, %v1716_v58 }
 0x885   :  { %v4195_v62 = vpop.eup %4194 }
 0x886   :  { %v1717_v2 = vmul.f32 %v4195_v62, %v1701_v39  ;;  %v1728_v13 = vadd.f32 %v1727_v57, %v1722_v63  ;;  %v1923_v62 = vrot.slane %v3821_v52, %v4383_v30 }
 0x888   :  { %v1723_v0 = vmul.f32 %v1721_v60, %v1717_v2 }
 0x88a   :  { %v1729_v1 = vadd.f32 %v1727_v57, %v1723_v0 }
 0x88c   :  { %v1730_v3 = vpack.c.bf16 %v1729_v1, %v1728_v13  ;;  %v3827_v13 = vld [vmem:[%s5218_s4 + $0x1] ss:$0 sm:$0xff] }
 0x88e   :  { %4001 = vmatmul.mubr.msk.bf16.vlgmr.msra.gmra.mxu0 %vm54_vm0, %v1730_v3 }
 0x88f   :  { %4020 = vmatprep.mubr.msk.bf16.mxu0 %vm4275_vm1, %v4274_v15  ;;  %4017 = vmatpush3.bf16.msra.mxu0 %v4146_v49 }
 0x890   :  { %4018 = vmatprep.subr.bf16.mxu0 %v4274_v15 }
 0x893   :  { %4019 = vmatpush3.bf16.msra.mxu0 %v4147_v42 }
 0x94e   :  { %v1791_v7 = vpop.f32.mrf.mxu0 }
 0x94f   :  { %v1792_v10 = vadd.f32 %v3811_v6, %v1791_v7 }
 0x950   :  { %v4002_v9 = vpop.f32.mrf.mxu0 }
 0x951   :  { %v1798_v20 = vmax.f32 %v1792_v10, 0.0 }
 0x952   :  { %v1794_v11 = vpop.f32.mrf.mxu0 }
 0x953   :  { %v1795_v12 = vadd.f32 %v3811_v6, %v1794_v11 }
 0x954   :  { %v4003_v14 = vpop.f32.mrf.mxu0 }
 0x955   :  { %v1799_v18 = vmax.f32 %v1795_v12, 0.0 }
 0x957   :  { %v1800_v21 = vpack.c.bf16 %v1799_v18, %v1798_v20 }
 0x959   :  { %4013 = vmatmul.mubr.msk.bf16.vlgmr.msra.gmra.mxu1 %vm1144_vm3, %v1800_v21 }
 0xa19   :  { %v1877_v23 = vpop.f32.mrf.mxu1 }
 0xa1a   :  { %v1878_v26 = vadd.f32 %v3815_v22, %v1877_v23 }
 0xa1b   :  { %v4014_v27 = vpop.f32.mrf.mxu1 }
 0xa1c   :  { %v4787_v29 = vadd.f32 %v1878_v26, %v4729_v28 }
 0xa1d   :  { %v1880_v31 = vpop.f32.mrf.mxu1 }
 0xa1e   :  { %v1881_v8 = vadd.f32 %v3815_v22, %v1880_v31  ;;  %v1888_v32 = vsel %vm54_vm0, %v4787_v29, 0.0 }
 0xa1f   :  { %1889 = vadd.xlane.f32.xlu1 %v1888_v32  ;;  %v4015_v16 = vpop.f32.mrf.mxu1 }
 0xa20   :  { %v4792_v36 = vadd.f32 %v1881_v8, %v4736_v34 }
 0xa22   :  { %v1891_v17 = vsel %vm54_vm0, %v4792_v36, 0.0 }
 0xa23   :  { %1892 = vadd.xlane.f32.xlu0 %v1891_v17 }
 0xaa8   :  { %v1890_v37 = vpop.xlane.xlu1 %1889 }
 0xaa9   :  { %v1894_v19 = vmul.f32 0.03125, %v1890_v37 }
 0xaab   :  { %v1896_v33 = vsub.f32 %v4787_v29, %v1894_v19 }
 0xaac   :  { %v1893_v28 = vpop.xlane.xlu0 %1892 }
 0xaad   :  { %v1895_v35 = vmul.f32 0.03125, %v1893_v28  ;;  %v1898_v38 = vmul.f32 %v1896_v33, %v1896_v33 }
 0xaaf   :  { %v1897_v39 = vsub.f32 %v4792_v36, %v1895_v35  ;;  %v1900_v48 = vsel %vm54_vm0, %v1898_v38, 0.0 }
 0xab0   :  { %1901 = vadd.xlane.f32.xlu1 %v1900_v48 }
 0xab1   :  { %v1899_v40 = vmul.f32 %v1897_v39, %v1897_v39 }
 0xab3   :  { %v1903_v34 = vsel %vm54_vm0, %v1899_v40, 0.0 }
 0xab4   :  { %1904 = vadd.xlane.f32.xlu0 %v1903_v34 }
 0xb39   :  { %v1902_v43 = vpop.xlane.xlu1 %1901 }
 0xb3a   :  { %v1906_v45 = vmul.f32 0.03125, %v1902_v43 }
 0xb3c   :  { %v1908_v46 = vadd.f32 1e-05, %v1906_v45 }
 0xb3d   :  { %v1905_v47 = vpop.xlane.xlu0 %1904 }
 0xb3e   :  { %4196 = vrsqrt.f32 %v1908_v46  ;;  %v1907_v50 = vmul.f32 0.03125, %v1905_v47 }
 0xb40   :  { %v1909_v44 = vadd.f32 1e-05, %v1907_v50 }
 0xb42   :  { %4198 = vrsqrt.f32 %v1909_v44 }
 0xb4b   :  { %v4197_v53 = vpop.eup %4196 }
 0xb4c   :  { %v1912_v55 = vmul.f32 %v4197_v53, %v1896_v33 }
 0xb4e   :  { %v1918_v60 = vmul.f32 %v1917_v56, %v1912_v55 }
 0xb4f   :  { %v4199_v58 = vpop.eup %4198 }
 0xb50   :  { %v1913_v59 = vmul.f32 %v4199_v58, %v1897_v39  ;;  %v1924_v63 = vadd.f32 %v1923_v62, %v1918_v60 }
 0xb52   :  { %v1919_v2 = vmul.f32 %v1917_v56, %v1913_v59 }
 0xb54   :  { %v1925_v57 = vadd.f32 %v1923_v62, %v1919_v2 }
 0xb56   :  { %v1926_v0 = vpack.c.bf16 %v1925_v57, %v1924_v63 }
 0xb58   :  { %4021 = vmatmul.mubr.msk.bf16.vlgmr.msra.gmra.mxu0 %vm54_vm0, %v1926_v0 }
 0xc18   :  { %v1989_v1 = vpop.f32.mrf.mxu0 }
 0xc19   :  { %v4816_v3 = vadd.f32 %v3827_v13, %v1989_v1 }
 0xc1a   :  { %v4022_v4 = vpop.f32.mrf.mxu0 }
 0xc1b   :  { %1998 = vrot.lane.b32.xlu1 %v4816_v3, %s4277_s16 }
 0xc1c   :  { %v1992_v5 = vpop.f32.mrf.mxu0 }
 0xc1d   :  { %v4820_v6 = vadd.f32 %v3827_v13, %v1992_v5 }
 0xc1e   :  { %v4023_v7 = vpop.f32.mrf.mxu0 }
 0xc1f   :  { %2004 = vrot.lane.b32.xlu1 %v4816_v3, %s4276_s15  ;;  %2000 = vrot.lane.b32.xlu0 %v4820_v6, %s4277_s16 }
 0xc23   :  { %2006 = vrot.lane.b32.xlu1 %v4820_v6, %s4276_s15  ;;  %2012 = vrot.lane.b32.xlu0 %v4820_v6, %s4278_s17 }
 0xc27   :  { %2010 = vrot.lane.b32.xlu1 %v4816_v3, %s4278_s17  ;;  %2290 = vrot.lane.b32.xlu0 %v4820_v6, %s4279_s18 }
 0xc2b   :  { %2288 = vrot.lane.b32.xlu1 %v4816_v3, %s4279_s18 }
 0xc8d   :  { %v4836_v9 = vpop.permute.xlu1 %1998 }
 0xc8e   :  { %2292 = vrot.lane.b32.xlu1 %v4836_v9, %s4279_s18 }
 0xc91   :  { %v4840_v10 = vpop.permute.xlu1 %2004  ;;  %v4842_v11 = vpop.permute.xlu0 %2000 }
 0xc92   :  { %2296 = vrot.lane.b32.xlu1 %v4840_v10, %s4279_s18  ;;  %2294 = vrot.lane.b32.xlu0 %v4842_v11, %s4279_s18  ;;  %v2016_v8 = vcombine.low %v4816_v3, %v4840_v10  ;;  %v2017_v32 = vcombine.high %v4816_v3, %v4840_v10 }
 0xc94   :  { %v2024_v34 = vrot.slane %v2016_v8, %v4417_v54  ;;  %v2031_v49 = vrot.slane %v2017_v32, %v4417_v54 }
 0xc95   :  { %v4848_v12 = vpop.permute.xlu1 %2006  ;;  %v4850_v14 = vpop.permute.xlu0 %2012 }
 0xc96   :  { %v2084_v20 = vcombine.low %v4820_v6, %v4848_v12  ;;  %v2085_v18 = vcombine.high %v4820_v6, %v4848_v12  ;;  %v2100_v21 = vcombine.low %v4842_v11, %v4850_v14  ;;  %v2101_v22 = vcombine.high %v4842_v11, %v4850_v14  ;;  %2298 = vrot.lane.b32.xlu0 %v4848_v12, %s4279_s18 }
 0xc98   :  { %v2092_v23 = vrot.slane %v2084_v20, %v4417_v54  ;;  %v2099_v26 = vrot.slane %v2085_v18, %v4417_v54  ;;  %v2108_v27 = vrot.slane %v2100_v21, %v4417_v54  ;;  %v2115_v31 = vrot.slane %v2101_v22, %v4417_v54 }
 0xc99   :  { %v4870_v16 = vpop.permute.xlu1 %2010 }
 0xc9a   :  { %v2116_v17 = vcombine.low %v2092_v23, %v2108_v27  ;;  %v2117_v37 = vcombine.high %v2092_v23, %v2108_v27  ;;  %v2132_v19 = vcombine.low %v2099_v26, %v2115_v31  ;;  %v2133_v33 = vcombine.high %v2099_v26, %v2115_v31  ;;  %2300 = vrot.lane.b32.xlu1 %v4870_v16, %s4279_s18 }
 0xc9b   :  { %v2032_v28 = vcombine.low %v4836_v9, %v4870_v16  ;;  %v2033_v35 = vcombine.high %v4836_v9, %v4870_v16  ;;  %2302 = vrot.lane.b32.xlu0 %v4850_v14, %s4279_s18 }
 0xc9c   :  { %v2124_v38 = vrot.slane %v2116_v17, %v4436_v61  ;;  %v2131_v39 = vrot.slane %v2117_v37, %v4436_v61  ;;  %v2140_v48 = vrot.slane %v2132_v19, %v4436_v61  ;;  %v2147_v40 = vrot.slane %v2133_v33, %v4436_v61 }
 0xc9d   :  { %v2040_v42 = vrot.slane %v2032_v28, %v4417_v54  ;;  %v2047_v43 = vrot.slane %v2033_v35, %v4417_v54 }
 0xc9e   :  { %v2220_v45 = vcombine.low %v2124_v38, %v2131_v39  ;;  %v3833_v46 = vcombine.high %v2124_v38, %v2131_v39  ;;  %v2236_v47 = vcombine.low %v2140_v48, %v2147_v40  ;;  %v3834_v50 = vcombine.high %v2140_v48, %v2147_v40 }
 0xc9f   :  { %v2048_v44 = vcombine.low %v2024_v34, %v2040_v42  ;;  %v2049_v52 = vcombine.high %v2024_v34, %v2040_v42  ;;  %v2064_v53 = vcombine.low %v2031_v49, %v2047_v43  ;;  %v2065_v55 = vcombine.high %v2031_v49, %v2047_v43 }
 0xca0   :  { %v2227_v56 = vrot.slane %v2220_v45, %v4417_v54  ;;  %v2235_v58 = vrot.slane %v3833_v46, %v4417_v54  ;;  %v2243_v59 = vrot.slane %v2236_v47, %v4417_v54  ;;  %v2251_v60 = vrot.slane %v3834_v50, %v4417_v54 }
 0xca1   :  { %v2056_v62 = vrot.slane %v2048_v44, %v4436_v61  ;;  %v2063_v2 = vrot.slane %v2049_v52, %v4436_v61  ;;  %v2072_v63 = vrot.slane %v2064_v53, %v4436_v61  ;;  %v2079_v57 = vrot.slane %v2065_v55, %v4436_v61  ;;  %v2289_v53 = vpop.permute.xlu1 %2288  ;;  %v2291_v55 = vpop.permute.xlu0 %2290 }
 0xca2   :  { %v2252_v0 = vcombine.low %v2227_v56, %v2235_v58  ;;  %v2268_v13 = vcombine.low %v2243_v59, %v2251_v60  ;;  %v2253_v1 = vcombine.high %v2227_v56, %v2235_v58  ;;  %v2269_v4 = vcombine.high %v2243_v59, %v2251_v60 }
 0xca3   :  { %v2152_v5 = vcombine.low %v2056_v62, %v2063_v2  ;;  %v3831_v7 = vcombine.high %v2056_v62, %v2063_v2  ;;  %v2168_v20 = vcombine.low %v2072_v63, %v2079_v57  ;;  %v3832_v18 = vcombine.high %v2072_v63, %v2079_v57 }
 0xca4   :  { %v2260_v21 = vrot.slane %v2252_v0, %v4436_v61  ;;  %v2276_v22 = vrot.slane %v2268_v13, %v4436_v61  ;;  %v2267_v23 = vrot.slane %v2253_v1, %v4436_v61  ;;  %v2283_v26 = vrot.slane %v2269_v4, %v4436_v61 }
 0xca5   :  { %v2159_v27 = vrot.slane %v2152_v5, %v4417_v54  ;;  %v2167_v31 = vrot.slane %v3831_v7, %v4417_v54  ;;  %v2175_v8 = vrot.slane %v2168_v20, %v4417_v54  ;;  %v2183_v32 = vrot.slane %v3832_v18, %v4417_v54 }
 0xca6   :  { %v2285_v17 = vcombine.high %v2260_v21, %v2276_v22  ;;  %v2286_v37 = vcombine.low %v2267_v23, %v2283_v26  ;;  %v2287_v19 = vcombine.high %v2267_v23, %v2283_v26  ;;  %v2284_v49 = vcombine.low %v2260_v21, %v2276_v22 }
 0xca7   :  { %v2184_v33 = vcombine.low %v2159_v27, %v2167_v31  ;;  %v2200_v28 = vcombine.low %v2175_v8, %v2183_v32  ;;  %v2185_v35 = vcombine.high %v2159_v27, %v2167_v31  ;;  %v2201_v38 = vcombine.high %v2175_v8, %v2183_v32 }
 0xca9   :  { %v2192_v39 = vrot.slane %v2184_v33, %v4436_v61  ;;  %v2208_v48 = vrot.slane %v2200_v28, %v4436_v61  ;;  %v2199_v40 = vrot.slane %v2185_v35, %v4436_v61  ;;  %v2215_v34 = vrot.slane %v2201_v38, %v4436_v61 }
 0xcab   :  { %v2216_v42 = vcombine.low %v2192_v39, %v2208_v48  ;;  %v2217_v43 = vcombine.high %v2192_v39, %v2208_v48  ;;  %v2218_v45 = vcombine.low %v2199_v40, %v2215_v34  ;;  %v2219_v46 = vcombine.high %v2199_v40, %v2215_v34 }
 0xcad   :  { %v2880_v47 = vpack.c.bf16 %v2284_v49, %v2216_v42  ;;  %v4908_v50 = vpack.c.bf16 %v2285_v17, %v2217_v43  ;;  %v4910_v44 = vpack.c.bf16 %v2286_v37, %v2218_v45  ;;  %v4912_v52 = vpack.c.bf16 %v2287_v19, %v2219_v46 }
 0xcaf   :  { %4032 = vmatprep.mubr.msk.bf16.mxu1 %vm1054_vm2, %v2880_v47 }
 0xd00   :  { %v2293_v56 = vpop.permute.xlu1 %2292 }
 0xd04   :  { %v2295_v58 = vpop.permute.xlu0 %2294  ;;  %v2297_v59 = vpop.permute.xlu1 %2296 }
 0xd05   :  { %v2312_v62 = vcombine.low %v2289_v53, %v2297_v59  ;;  %v2313_v2 = vcombine.high %v2289_v53, %v2297_v59 }
 0xd07   :  { %v2320_v20 = vrot.slane %v2312_v62, %v4417_v54  ;;  %v2327_v18 = vrot.slane %v2313_v2, %v4417_v54 }
 0xd08   :  { %v2299_v60 = vpop.permute.xlu0 %2298 }
 0xd09   :  { %v2380_v63 = vcombine.low %v2291_v55, %v2299_v60  ;;  %v2381_v57 = vcombine.high %v2291_v55, %v2299_v60 }
 0xd0b   :  { %v2388_v23 = vrot.slane %v2380_v63, %v4417_v54  ;;  %v2395_v26 = vrot.slane %v2381_v57, %v4417_v54 }
 0xd0c   :  { %v2301_v0 = vpop.permute.xlu1 %2300 }
 0xd0d   :  { %v2328_v13 = vcombine.low %v2293_v56, %v2301_v0  ;;  %v2329_v1 = vcombine.high %v2293_v56, %v2301_v0  ;;  %v2303_v4 = vpop.permute.xlu0 %2302 }
 0xd0e   :  { %v2396_v5 = vcombine.low %v2295_v58, %v2303_v4  ;;  %v2397_v7 = vcombine.high %v2295_v58, %v2303_v4 }
 0xd0f   :  { %v2336_v21 = vrot.slane %v2328_v13, %v4417_v54  ;;  %v2343_v22 = vrot.slane %v2329_v1, %v4417_v54 }
 0xd10   :  { %v2404_v27 = vrot.slane %v2396_v5, %v4417_v54  ;;  %v2411_v31 = vrot.slane %v2397_v7, %v4417_v54 }
 0xd11   :  { %v2344_v8 = vcombine.low %v2320_v20, %v2336_v21  ;;  %v2345_v32 = vcombine.high %v2320_v20, %v2336_v21  ;;  %v2360_v17 = vcombine.low %v2327_v18, %v2343_v22  ;;  %v2361_v37 = vcombine.high %v2327_v18, %v2343_v22 }
 0xd12   :  { %v2412_v19 = vcombine.low %v2388_v23, %v2404_v27  ;;  %v2413_v33 = vcombine.high %v2388_v23, %v2404_v27  ;;  %v2428_v28 = vcombine.low %v2395_v26, %v2411_v31  ;;  %v2429_v35 = vcombine.high %v2395_v26, %v2411_v31 }
 0xd13   :  { %v2352_v38 = vrot.slane %v2344_v8, %v4436_v61  ;;  %v2359_v39 = vrot.slane %v2345_v32, %v4436_v61  ;;  %v2368_v48 = vrot.slane %v2360_v17, %v4436_v61  ;;  %v2375_v40 = vrot.slane %v2361_v37, %v4436_v61 }
 0xd14   :  { %v2420_v34 = vrot.slane %v2412_v19, %v4436_v61  ;;  %v2427_v49 = vrot.slane %v2413_v33, %v4436_v61  ;;  %v2436_v42 = vrot.slane %v2428_v28, %v4436_v61  ;;  %v2443_v43 = vrot.slane %v2429_v35, %v4436_v61 }
 0xd15   :  { %v2448_v45 = vcombine.low %v2352_v38, %v2359_v39  ;;  %v3835_v46 = vcombine.high %v2352_v38, %v2359_v39  ;;  %v2464_v47 = vcombine.low %v2368_v48, %v2375_v40  ;;  %v3836_v53 = vcombine.high %v2368_v48, %v2375_v40 }
 0xd16   :  { %v2516_v55 = vcombine.low %v2420_v34, %v2427_v49  ;;  %v3837_v56 = vcombine.high %v2420_v34, %v2427_v49  ;;  %v2532_v58 = vcombine.low %v2436_v42, %v2443_v43  ;;  %v3838_v59 = vcombine.high %v2436_v42, %v2443_v43 }
 0xd17   :  { %v2455_v60 = vrot.slane %v2448_v45, %v4417_v54  ;;  %v2463_v62 = vrot.slane %v3835_v46, %v4417_v54  ;;  %v2471_v2 = vrot.slane %v2464_v47, %v4417_v54  ;;  %v2479_v63 = vrot.slane %v3836_v53, %v4417_v54 }
 0xd18   :  { %v2523_v57 = vrot.slane %v2516_v55, %v4417_v54  ;;  %v2531_v0 = vrot.slane %v3837_v56, %v4417_v54  ;;  %v2539_v13 = vrot.slane %v2532_v58, %v4417_v54  ;;  %v2547_v1 = vrot.slane %v3838_v59, %v4417_v54  ;;  %v4243_v58 = vld [vmem:[%s5215_s1 + $0x10] sm:$0xff] }
 0xd19   :  { %v2481_v4 = vcombine.high %v2455_v60, %v2463_v62  ;;  %v2497_v5 = vcombine.high %v2471_v2, %v2479_v63  ;;  %v2480_v27 = vcombine.low %v2455_v60, %v2463_v62  ;;  %v2496_v31 = vcombine.low %v2471_v2, %v2479_v63 }
 0xd1a   :  { %v2549_v7 = vcombine.high %v2523_v57, %v2531_v0  ;;  %v2565_v20 = vcombine.high %v2539_v13, %v2547_v1  ;;  %v2548_v8 = vcombine.low %v2523_v57, %v2531_v0  ;;  %v2564_v19 = vcombine.low %v2539_v13, %v2547_v1  ;;  %v4245_v57 = vld [vmem:[%s5215_s1 + $0x8] sm:$0xff]  ;;  %v4246_v1 = vld [vmem:[%s5215_s1 + $0x18] sm:$0xff] }
 0xd1b   :  { %v2495_v18 = vrot.slane %v2481_v4, %v4436_v61  ;;  %v2511_v21 = vrot.slane %v2497_v5, %v4436_v61  ;;  %v2488_v28 = vrot.slane %v2480_v27, %v4436_v61  ;;  %v2504_v35 = vrot.slane %v2496_v31, %v4436_v61 }
 0xd1c   :  { %v2563_v22 = vrot.slane %v2549_v7, %v4436_v61  ;;  %v2579_v23 = vrot.slane %v2565_v20, %v4436_v61  ;;  %v2556_v48 = vrot.slane %v2548_v8, %v4436_v61  ;;  %v2572_v40 = vrot.slane %v2564_v19, %v4436_v61  ;;  %v4247_v20 = vld [vmem:[%s5215_s1 + $0x20] sm:$0xff]  ;;  %v4249_v8 = vld [vmem:[%s5215_s1 + $0x28] sm:$0xff] }
 0xd1d   :  { %v2515_v26 = vcombine.high %v2495_v18, %v2511_v21  ;;  %v2514_v17 = vcombine.low %v2495_v18, %v2511_v21  ;;  %v2513_v34 = vcombine.high %v2488_v28, %v2504_v35  ;;  %v2512_v45 = vcombine.low %v2488_v28, %v2504_v35 }
 0xd1e   :  { %v2583_v32 = vcombine.high %v2563_v22, %v2579_v23  ;;  %v2582_v37 = vcombine.low %v2563_v22, %v2579_v23  ;;  %v2581_v49 = vcombine.high %v2556_v48, %v2572_v40  ;;  %v2580_v46 = vcombine.low %v2556_v48, %v2572_v40  ;;  %v4248_v22 = vld [vmem:[%s5215_s1 + $0x30] sm:$0xff] }
 0xd20   :  { %v2887_v33 = vpack.c.bf16 %v2583_v32, %v2515_v26  ;;  %v2886_v39 = vpack.c.bf16 %v2582_v37, %v2514_v17  ;;  %v2885_v43 = vpack.c.bf16 %v2581_v49, %v2513_v34  ;;  %v2884_v53 = vpack.c.bf16 %v2580_v46, %v2512_v45  ;;  %v4250_v17 = vld [vmem:[%s5215_s1 + $0x38] sm:$0xff] }
 0xd22   :  { %4088 = vmatprep.subr.msk.bf16.mxu1 %vm1054_vm2, %v2887_v33  ;;  %v2910_v38 = vsel %vm1054_vm2, %v2887_v33, 0  ;;  %v2907_v42 = vsel %vm1054_vm2, %v2886_v39, 0  ;;  %v2904_v47 = vsel %vm1054_vm2, %v2885_v43, 0  ;;  %v2901_v55 = vsel %vm1054_vm2, %v2884_v53, 0 }
 0xd23   :  { %4025 = vmatpush3.bf16.xpose.msra.mxu1 %v2910_v38 }
 0xd24   :  { %4089 = vmatprep.subr.msk.bf16.mxu1 %vm1054_vm2, %v2886_v39 }
 0xd2b   :  { %4027 = vmatpush3.bf16.xpose.msra.mxu1 %v2907_v42 }
 0xd2c   :  { %4090 = vmatprep.subr.msk.bf16.mxu1 %vm1054_vm2, %v2885_v43 }
 0xd33   :  { %4029 = vmatpush3.bf16.xpose.msra.mxu1 %v2904_v47 }
 0xd34   :  { %4091 = vmatprep.subr.msk.bf16.mxu1 %vm1054_vm2, %v2884_v53 }
 0xd3b   :  { %4031 = vmatpush3.bf16.xpose.msra.mxu1 %v2901_v55 }
 0xd3c   :  { %4072 = vmatprep.subr.bf16.mxu1 %v4274_v15 }
 0xd42   :  { %4033 = vmatmul.mubr.msk.bf16.vlgmr.msra.gmra.mxu1 %vm1054_vm2, %v4908_v50  ;;  %v4244_v50 = vld [vmem:[%s5215_s1] sm:$0xff] }
 0xd43   :  { %4036 = vmatprep.mubr.msk.bf16.mxu1 %vm1054_vm2, %v4910_v44 }
 0xd4a   :  { %4037 = vmatmul.mubr.msk.bf16.gmra.mxu1 %vm1054_vm2, %v4912_v52 }
 0xd4b   :  { %4080 = vmatprep.mubr.msk.bf16.mxu1 %vm4275_vm1, %v4274_v15 }
 0xe02   :  { %v4034_v56 = vpop.f32.mrf.mxu1 }
 0xe03   :  { %v2955_v59 = vadd.f32 %v4243_v58, %v4034_v56 }
 0xe04   :  { %v2946_v60 = vpop.f32.mrf.mxu1 }
 0xe05   :  { %v2947_v62 = vadd.f32 %v4244_v50, %v2946_v60  ;;  %v2983_v44 = vsel %vm1144_vm3, %v2955_v59, -inf }
 0xe06   :  { %2984 = vmax.xlane.f32.xlu0 %v2983_v44  ;;  %v4035_v2 = vpop.f32.mrf.mxu1 }
 0xe07   :  { %v2977_v52 = vsel %vm1144_vm3, %v2947_v62, -inf  ;;  %v2958_v4 = vadd.f32 %v4246_v1, %v4035_v2 }
 0xe08   :  { %v2949_v63 = vpop.f32.mrf.mxu1  ;;  %2978 = vmax.xlane.f32.xlu1 %v2977_v52 }
 0xe09   :  { %v2950_v0 = vadd.f32 %v4245_v57, %v2949_v63  ;;  %v2986_v26 = vsel %vm1144_vm3, %v2958_v4, -inf }
 0xe0a   :  { %v4038_v13 = vpop.f32.mrf.mxu1 }
 0xe0b   :  { %v2980_v5 = vsel %vm1144_vm3, %v2950_v0, -inf  ;;  %v2971_v23 = vadd.f32 %v4248_v22, %v4038_v13 }
 0xe0c   :  { %v2962_v7 = vpop.f32.mrf.mxu1  ;;  %2981 = vmax.xlane.f32.xlu0 %v2980_v5 }
 0xe0d   :  { %v2963_v18 = vadd.f32 %v4247_v20, %v2962_v7  ;;  %v2995_v33 = vsel %vm1144_vm3, %v2971_v23, -inf }
 0xe0e   :  { %v4039_v21 = vpop.f32.mrf.mxu1 }
 0xe0f   :  { %v2989_v27 = vsel %vm1144_vm3, %v2963_v18, -inf  ;;  %v2974_v37 = vadd.f32 %v4250_v17, %v4039_v21 }
 0xe10   :  { %v2965_v31 = vpop.f32.mrf.mxu1  ;;  %2987 = vmax.xlane.f32.xlu0 %v2986_v26  ;;  %2990 = vmax.xlane.f32.xlu1 %v2989_v27 }
 0xe11   :  { %v2966_v32 = vadd.f32 %v4249_v8, %v2965_v31  ;;  %v2998_v28 = vsel %vm1144_vm3, %v2974_v37, -inf }
 0xe13   :  { %v2992_v19 = vsel %vm1144_vm3, %v2966_v32, -inf }
 0xe14   :  { %2993 = vmax.xlane.f32.xlu0 %v2992_v19  ;;  %2996 = vmax.xlane.f32.xlu1 %v2995_v33 }
 0xe18   :  { %2999 = vmax.xlane.f32.xlu0 %v2998_v28 }
 0xe25   :  { %2584 = vrot.lane.b32.xlu1 %v4816_v3, %s4282_s21 }
 0xe29   :  { %2588 = vrot.lane.b32.xlu1 %v4836_v9, %s4282_s21 }
 0xe2d   :  { %2590 = vrot.lane.b32.xlu1 %v4842_v11, %s4282_s21 }
 0xe2e   :  { %2586 = vrot.lane.b32.xlu0 %v4820_v6, %s4282_s21 }
 0xe31   :  { %2592 = vrot.lane.b32.xlu1 %v4840_v10, %s4282_s21 }
 0xe32   :  { %2594 = vrot.lane.b32.xlu0 %v4848_v12, %s4282_s21 }
 0xe35   :  { %2596 = vrot.lane.b32.xlu1 %v4870_v16, %s4282_s21 }
 0xe36   :  { %2598 = vrot.lane.b32.xlu0 %v4850_v14, %s4282_s21 }
 0xe8f   :  { %v2985_v3 = vpop.xlane.xlu0 %2984 }
 0xe90   :  { %v3003_v9 = vsub.f32 %v2955_v59, %v2985_v3 }
 0xe91   :  { %v2979_v35 = vpop.xlane.xlu1 %2978 }
 0xe92   :  { %v3013_v38 = vmul.f32 1.442695, %v3003_v9  ;;  %v3001_v11 = vsub.f32 %v2947_v62, %v2979_v35 }
 0xe94   :  { %4200 = vpow2.f32 %v3013_v38  ;;  %v3009_v39 = vmul.f32 1.442695, %v3001_v11 }
 0xe95   :  { %v2982_v6 = vpop.xlane.xlu0 %2981 }
 0xe96   :  { %4202 = vpow2.f32 %v3009_v39  ;;  %v3002_v48 = vsub.f32 %v2950_v0, %v2982_v6 }
 0xe98   :  { %v3011_v10 = vmul.f32 1.442695, %v3002_v48 }
 0xe99   :  { %v2988_v40 = vpop.xlane.xlu0 %2987  ;;  %v2991_v34 = vpop.xlane.xlu1 %2990 }
 0xe9a   :  { %4204 = vpow2.f32 %v3011_v10  ;;  %v3004_v12 = vsub.f32 %v2958_v4, %v2988_v40  ;;  %v3005_v49 = vsub.f32 %v2963_v18, %v2991_v34 }
 0xe9c   :  { %v3015_v16 = vmul.f32 1.442695, %v3004_v12  ;;  %v3017_v42 = vmul.f32 1.442695, %v3005_v49 }
 0xe9d   :  { %v2994_v43 = vpop.xlane.xlu0 %2993  ;;  %v2997_v14 = vpop.xlane.xlu1 %2996 }
 0xe9e   :  { %4206 = vpow2.f32 %v3015_v16  ;;  %v3006_v45 = vsub.f32 %v2966_v32, %v2994_v43  ;;  %v3007_v46 = vsub.f32 %v2971_v23, %v2997_v14 }
 0xe9f   :  { %4208 = vpow2.f32 %v3017_v42 }
 0xea0   :  { %v3019_v47 = vmul.f32 1.442695, %v3006_v45  ;;  %v3021_v53 = vmul.f32 1.442695, %v3007_v46 }
 0xea1   :  { %v5012_v55 = vpop.eup %4200  ;;  %v3000_v56 = vpop.xlane.xlu0 %2999 }
 0xea2   :  { %v2585_v58 = vpop.permute.xlu1 %2584  ;;  %4210 = vpow2.f32 %v3019_v47  ;;  %v3008_v59 = vsub.f32 %v2974_v37, %v3000_v56  ;;  %v3031_v60 = vsel %vm1144_vm3, %v5012_v55, 0.0 }
 0xea3   :  { %v5016_v50 = vpop.eup %4202  ;;  %4212 = vpow2.f32 %v3021_v53  ;;  %3032 = vadd.xlane.f32.xlu0 %v3031_v60 }
 0xea4   :  { %v3023_v62 = vmul.f32 1.442695, %v3008_v59  ;;  %v3025_v44 = vsel %vm1144_vm3, %v5016_v50, 0.0 }
 0xea5   :  { %v2587_v2 = vpop.permute.xlu0 %2586  ;;  %3026 = vadd.xlane.f32.xlu1 %v3025_v44 }
 0xea6   :  { %v2589_v52 = vpop.permute.xlu1 %2588  ;;  %4214 = vpow2.f32 %v3023_v62 }
 0xea7   :  { %v5020_v63 = vpop.eup %4204 }
 0xea8   :  { %v3028_v57 = vsel %vm1144_vm3, %v5020_v63, 0.0 }
 0xea9   :  { %3029 = vadd.xlane.f32.xlu0 %v3028_v57  ;;  %v2595_v0 = vpop.permute.xlu0 %2594 }
 0xeaa   :  { %v2591_v13 = vpop.permute.xlu1 %2590  ;;  %v2676_v5 = vcombine.low %v2587_v2, %v2595_v0  ;;  %v2677_v7 = vcombine.high %v2587_v2, %v2595_v0 }
 0xeab   :  { %v5024_v1 = vpop.eup %4206 }
 0xeac   :  { %v5026_v4 = vpop.eup %4208  ;;  %v3034_v20 = vsel %vm1144_vm3, %v5024_v1, 0.0  ;;  %v2684_v32 = vrot.slane %v2676_v5, %v4417_v54  ;;  %v2691_v17 = vrot.slane %v2677_v7, %v4417_v54 }
 0xead   :  { %3035 = vadd.xlane.f32.xlu0 %v3034_v20  ;;  %v2599_v18 = vpop.permute.xlu0 %2598  ;;  %v3037_v21 = vsel %vm1144_vm3, %v5026_v4, 0.0 }
 0xeae   :  { %v2593_v22 = vpop.permute.xlu1 %2592  ;;  %v2692_v23 = vcombine.low %v2591_v13, %v2599_v18  ;;  %v2693_v26 = vcombine.high %v2591_v13, %v2599_v18  ;;  %3038 = vadd.xlane.f32.xlu1 %v3037_v21 }
 0xeaf   :  { %v5032_v27 = vpop.eup %4210  ;;  %v2608_v31 = vcombine.low %v2585_v58, %v2593_v22  ;;  %v2609_v33 = vcombine.high %v2585_v58, %v2593_v22 }
 0xeb0   :  { %v5034_v8 = vpop.eup %4212  ;;  %v2700_v37 = vrot.slane %v2692_v23, %v4417_v54  ;;  %v2707_v19 = vrot.slane %v2693_v26, %v4417_v54  ;;  %v3040_v28 = vsel %vm1144_vm3, %v5032_v27, 0.0 }
 0xeb1   :  { %v3043_v3 = vsel %vm1144_vm3, %v5034_v8, 0.0  ;;  %3041 = vadd.xlane.f32.xlu0 %v3040_v28  ;;  %v2616_v48 = vrot.slane %v2608_v31, %v4417_v54  ;;  %v2623_v42 = vrot.slane %v2609_v33, %v4417_v54 }
 0xeb2   :  { %v2597_v9 = vpop.permute.xlu1 %2596  ;;  %v2708_v35 = vcombine.low %v2684_v32, %v2700_v37  ;;  %v2709_v38 = vcombine.high %v2684_v32, %v2700_v37  ;;  %v2724_v11 = vcombine.low %v2691_v17, %v2707_v19  ;;  %v2725_v39 = vcombine.high %v2691_v17, %v2707_v19  ;;  %3044 = vadd.xlane.f32.xlu1 %v3043_v3 }
 0xeb3   :  { %v5044_v6 = vpop.eup %4214  ;;  %v2624_v10 = vcombine.low %v2589_v52, %v2597_v9  ;;  %v2625_v40 = vcombine.high %v2589_v52, %v2597_v9 }
 0xeb4   :  { %v2716_v34 = vrot.slane %v2708_v35, %v4436_v61  ;;  %v2723_v12 = vrot.slane %v2709_v38, %v4436_v61  ;;  %v2732_v49 = vrot.slane %v2724_v11, %v4436_v61  ;;  %v2739_v16 = vrot.slane %v2725_v39, %v4436_v61 }
 0xeb5   :  { %v2632_v43 = vrot.slane %v2624_v10, %v4417_v54  ;;  %v2639_v14 = vrot.slane %v2625_v40, %v4417_v54  ;;  %v3046_v45 = vsel %vm1144_vm3, %v5044_v6, 0.0 }
 0xeb6   :  { %v2812_v46 = vcombine.low %v2716_v34, %v2723_v12  ;;  %v3841_v47 = vcombine.high %v2716_v34, %v2723_v12  ;;  %v2828_v53 = vcombine.low %v2732_v49, %v2739_v16  ;;  %v3842_v56 = vcombine.high %v2732_v49, %v2739_v16  ;;  %3047 = vadd.xlane.f32.xlu0 %v3046_v45 }
 0xeb7   :  { %v2640_v58 = vcombine.low %v2616_v48, %v2632_v43  ;;  %v2641_v59 = vcombine.high %v2616_v48, %v2632_v43  ;;  %v2656_v60 = vcombine.low %v2623_v42, %v2639_v14  ;;  %v2657_v62 = vcombine.high %v2623_v42, %v2639_v14 }
 0xeb8   :  { %v2819_v44 = vrot.slane %v2812_v46, %v4417_v54  ;;  %v2827_v2 = vrot.slane %v3841_v47, %v4417_v54  ;;  %v2835_v52 = vrot.slane %v2828_v53, %v4417_v54  ;;  %v2843_v57 = vrot.slane %v3842_v56, %v4417_v54 }
 0xeb9   :  { %v2648_v0 = vrot.slane %v2640_v58, %v4436_v61  ;;  %v2655_v13 = vrot.slane %v2641_v59, %v4436_v61  ;;  %v2664_v5 = vrot.slane %v2656_v60, %v4436_v61  ;;  %v2671_v7 = vrot.slane %v2657_v62, %v4436_v61 }
 0xeba   :  { %v2845_v20 = vcombine.high %v2819_v44, %v2827_v2  ;;  %v2861_v18 = vcombine.high %v2835_v52, %v2843_v57  ;;  %v2844_v39 = vcombine.low %v2819_v44, %v2827_v2  ;;  %v2860_v48 = vcombine.low %v2835_v52, %v2843_v57 }
 0xebb   :  { %v2744_v21 = vcombine.low %v2648_v0, %v2655_v13  ;;  %v3839_v22 = vcombine.high %v2648_v0, %v2655_v13  ;;  %v2760_v23 = vcombine.low %v2664_v5, %v2671_v7  ;;  %v3840_v26 = vcombine.high %v2664_v5, %v2671_v7 }
 0xebc   :  { %v2859_v19 = vrot.slane %v2845_v20, %v4436_v61  ;;  %v2875_v33 = vrot.slane %v2861_v18, %v4436_v61  ;;  %v2852_v43 = vrot.slane %v2844_v39, %v4436_v61  ;;  %v2868_v14 = vrot.slane %v2860_v48, %v4436_v61 }
 0xebd   :  { %v2751_v31 = vrot.slane %v2744_v21, %v4417_v54  ;;  %v2759_v32 = vrot.slane %v3839_v22, %v4417_v54  ;;  %v2767_v17 = vrot.slane %v2760_v23, %v4417_v54  ;;  %v2775_v37 = vrot.slane %v3840_v26, %v4417_v54 }
 0xebe   :  { %v2879_v10 = vcombine.high %v2859_v19, %v2875_v33  ;;  %v2878_v42 = vcombine.low %v2859_v19, %v2875_v33  ;;  %v2877_v47 = vcombine.high %v2852_v43, %v2868_v14  ;;  %v2876_v58 = vcombine.low %v2852_v43, %v2868_v14 }
 0xebf   :  { %v2777_v28 = vcombine.high %v2751_v31, %v2759_v32  ;;  %v2793_v3 = vcombine.high %v2767_v17, %v2775_v37  ;;  %v2776_v9 = vcombine.low %v2751_v31, %v2759_v32  ;;  %v2792_v35 = vcombine.low %v2767_v17, %v2775_v37 }
 0xec1   :  { %v2791_v38 = vrot.slane %v2777_v28, %v4436_v61  ;;  %v2807_v11 = vrot.slane %v2793_v3, %v4436_v61  ;;  %v2784_v12 = vrot.slane %v2776_v9, %v4436_v61  ;;  %v2800_v49 = vrot.slane %v2792_v35, %v4436_v61 }
 0xec3   :  { %v2811_v40 = vcombine.high %v2791_v38, %v2807_v11  ;;  %v2810_v34 = vcombine.low %v2791_v38, %v2807_v11  ;;  %v2809_v46 = vcombine.high %v2784_v12, %v2800_v49  ;;  %v2808_v56 = vcombine.low %v2784_v12, %v2800_v49 }
 0xec5   :  { %v3072_v16 = vpack.c.bf16 %v2879_v10, %v2811_v40  ;;  %v3071_v45 = vpack.c.bf16 %v2878_v42, %v2810_v34  ;;  %v3070_v53 = vpack.c.bf16 %v2877_v47, %v2809_v46  ;;  %v3069_v59 = vpack.c.bf16 %v2876_v58, %v2808_v56 }
 0xec7   :  { %4040 = vmatprep.subr.bf16.mxu0 %v3072_v16 }
 0xec8   :  { %4041 = vmatpush3.bf16.msra.mxu0 %v3072_v16 }
 0xec9   :  { %4042 = vmatprep.subr.bf16.mxu0 %v3071_v45 }
 0xecc   :  { %4043 = vmatpush3.bf16.msra.mxu0 %v3071_v45 }
 0xecd   :  { %4044 = vmatprep.subr.bf16.mxu0 %v3070_v53 }
 0xed0   :  { %4045 = vmatpush3.bf16.msra.mxu0 %v3070_v53 }
 0xed1   :  { %4046 = vmatprep.subr.bf16.mxu0 %v3069_v59 }
 0xed4   :  { %4047 = vmatpush3.bf16.msra.mxu0 %v3069_v59 }
 0xed5   :  { %4056 = vmatprep.subr.bf16.mxu0 %v4274_v15 }
 0xf2c   :  { %v3033_v60 = vpop.xlane.xlu0 %3032 }
 0xf2e   :  { %v3027_v62 = vpop.xlane.xlu1 %3026 }
 0xf2f   :  { %4216 = vrcp.f32 %v3027_v62 }
 0xf32   :  { %v3030_v44 = vpop.xlane.xlu0 %3029 }
 0xf33   :  { %4218 = vrcp.f32 %v3030_v44 }
 0xf34   :  { %4220 = vrcp.f32 %v3033_v60 }
 0xf36   :  { %v3036_v2 = vpop.xlane.xlu0 %3035 }
 0xf37   :  { %4222 = vrcp.f32 %v3036_v2  ;;  %v3039_v52 = vpop.xlane.xlu1 %3038 }
 0xf38   :  { %4224 = vrcp.f32 %v3039_v52 }
 0xf3a   :  { %v3042_v57 = vpop.xlane.xlu0 %3041 }
 0xf3b   :  { %4226 = vrcp.f32 %v3042_v57  ;;  %v3045_v0 = vpop.xlane.xlu1 %3044 }
 0xf3c   :  { %v4217_v13 = vpop.eup %4216  ;;  %4228 = vrcp.f32 %v3045_v0 }
 0xf3d   :  { %v3057_v20 = vmul.f32 %v4217_v13, %v5016_v50 }
 0xf3f   :  { %v3048_v5 = vpop.xlane.xlu0 %3047 }
 0xf40   :  { %v4219_v7 = vpop.eup %4218  ;;  %4230 = vrcp.f32 %v3048_v5 }
 0xf41   :  { %v3058_v18 = vmul.f32 %v4219_v7, %v5020_v63  ;;  %v4221_v21 = vpop.eup %4220 }
 0xf42   :  { %v3059_v26 = vmul.f32 %v4221_v21, %v5012_v55 }
 0xf43   :  { %v3065_v22 = vpack.c.bf16 %v3058_v18, %v3057_v20 }
 0xf44   :  { %v4223_v23 = vpop.eup %4222 }
 0xf45   :  { %4048 = vmatprep.mubr.msk.bf16.mxu0 %vm1144_vm3, %v3065_v22  ;;  %v3060_v31 = vmul.f32 %v4223_v23, %v5024_v1  ;;  %v4225_v32 = vpop.eup %4224  ;;  %v4148_v1 = vld [vmem:[%s5219_s5 + $0x18] sm:$0xff]  }
 0xf46   :  { %v3061_v19 = vmul.f32 %v4225_v32, %v5026_v4 }
 0xf47   :  { %v3066_v17 = vpack.c.bf16 %v3060_v31, %v3059_v26 }
 0xf48   :  { %v4227_v37 = vpop.eup %4226 }
 0xf49   :  { %4049 = vmatmul.mubr.msk.bf16.vlgmr.msra.gmra.mxu0 %vm1144_vm3, %v3066_v17  ;;  %v3062_v50 = vmul.f32 %v4227_v37, %v5032_v27  ;;  %v4229_v33 = vpop.eup %4228 }
 0xf4a   :  { %v3063_v3 = vmul.f32 %v4229_v33, %v5034_v8  ;;  %4057 = vmatpush3.bf16.msra.mxu0 %v4148_v1 }
 0xf4b   :  { %v3067_v63 = vpack.c.bf16 %v3062_v50, %v3061_v19  ;;  %4058 = vmatprep.subr.bf16.mxu0 %v4274_v15 }
 0xf4d   :  { %v4231_v28 = vpop.eup %4230  ;;  %4052 = vmatprep.mubr.msk.bf16.mxu0 %vm1144_vm3, %v3067_v63 }
 0xf4e   :  { %v3064_v55 = vmul.f32 %v4231_v28, %v5044_v6 }
 0xf50   :  { %v3068_v9 = vpack.c.bf16 %v3064_v55, %v3063_v3 }
 0xf52   :  { %4053 = vmatmul.mubr.msk.bf16.gmra.mxu0 %vm1144_vm3, %v3068_v9 }
 0xf53   :  { %4060 = vmatprep.mubr.msk.bf16.mxu0 %vm4275_vm1, %v4274_v15 }
0x1009   :  { %v4050_v4 = vpop.f32.mrf.mxu0 }
0x100b   :  { %v3119_v27 = vpop.f32.mrf.mxu0 }
0x100d   :  { %v4051_v35 = vpop.f32.mrf.mxu0 }
0x100f   :  { %v3122_v38 = vpop.f32.mrf.mxu0 }
0x1012   :  { %v4054_v8 = vpop.f32.mrf.mxu0 }
0x1013   :  { %v3166_v11 = vcombine.low %v4050_v4, %v4054_v8  ;;  %v3167_v6 = vcombine.high %v4050_v4, %v4054_v8  ;;  %v4149_v8 = vld [vmem:[%s5219_s5 + $0x10] sm:$0xff]  }
0x1014   :  { %v3135_v39 = vpop.f32.mrf.mxu0  ;;  %4059 = vmatpush3.bf16.msra.mxu0 %v4149_v8 }
0x1015   :  { %v3150_v48 = vcombine.low %v3119_v27, %v3135_v39  ;;  %v3151_v10 = vcombine.high %v3119_v27, %v3135_v39  ;;  %v3174_v34 = vrot.slane %v3166_v11, %v4417_v54  ;;  %v3181_v12 = vrot.slane %v3167_v6, %v4417_v54  ;;  %4064 = vmatprep.subr.bf16.mxu0 %v4274_v15 }
0x1016   :  { %v4055_v40 = vpop.f32.mrf.mxu0 }
0x1017   :  { %v3158_v49 = vrot.slane %v3150_v48, %v4417_v54  ;;  %v3165_v16 = vrot.slane %v3151_v10, %v4417_v54  ;;  %v3234_v42 = vcombine.low %v4051_v35, %v4055_v40  ;;  %v3235_v43 = vcombine.high %v4051_v35, %v4055_v40 }
0x1018   :  { %v3138_v14 = vpop.f32.mrf.mxu0 }
0x1019   :  { %v3182_v45 = vcombine.low %v3158_v49, %v3174_v34  ;;  %v3183_v46 = vcombine.high %v3158_v49, %v3174_v34  ;;  %v3198_v47 = vcombine.low %v3165_v16, %v3181_v12  ;;  %v3199_v53 = vcombine.high %v3165_v16, %v3181_v12 }
0x101a   :  { %v3218_v56 = vcombine.low %v3122_v38, %v3138_v14  ;;  %v3219_v58 = vcombine.high %v3122_v38, %v3138_v14  ;;  %v3242_v2 = vrot.slane %v3234_v42, %v4417_v54  ;;  %v3249_v52 = vrot.slane %v3235_v43, %v4417_v54 }
0x101b   :  { %v3190_v59 = vrot.slane %v3182_v45, %v4436_v61  ;;  %v3197_v60 = vrot.slane %v3183_v46, %v4436_v61  ;;  %v3206_v62 = vrot.slane %v3198_v47, %v4436_v61  ;;  %v3213_v44 = vrot.slane %v3199_v53, %v4436_v61 }
0x101c   :  { %v3226_v57 = vrot.slane %v3218_v56, %v4417_v54  ;;  %v3233_v0 = vrot.slane %v3219_v58, %v4417_v54 }
0x101d   :  { %v3286_v13 = vcombine.low %v3190_v59, %v3197_v60  ;;  %v3851_v5 = vcombine.high %v3190_v59, %v3197_v60  ;;  %v3302_v7 = vcombine.low %v3206_v62, %v3213_v44  ;;  %v3852_v20 = vcombine.high %v3206_v62, %v3213_v44 }
0x101e   :  { %v3250_v18 = vcombine.low %v3226_v57, %v3242_v2  ;;  %v3251_v21 = vcombine.high %v3226_v57, %v3242_v2  ;;  %v3266_v22 = vcombine.low %v3233_v0, %v3249_v52  ;;  %v3267_v23 = vcombine.high %v3233_v0, %v3249_v52 }
0x101f   :  { %v3293_v26 = vrot.slane %v3286_v13, %v4417_v54  ;;  %v3301_v31 = vrot.slane %v3851_v5, %v4417_v54  ;;  %v3309_v32 = vrot.slane %v3302_v7, %v4417_v54  ;;  %v3317_v17 = vrot.slane %v3852_v20, %v4417_v54 }
0x1020   :  { %v3258_v37 = vrot.slane %v3250_v18, %v4436_v61  ;;  %v3265_v19 = vrot.slane %v3251_v21, %v4436_v61  ;;  %v3274_v50 = vrot.slane %v3266_v22, %v4436_v61  ;;  %v3281_v33 = vrot.slane %v3267_v23, %v4436_v61 }
0x1021   :  { %v3319_v63 = vcombine.high %v3293_v26, %v3301_v31  ;;  %v3335_v28 = vcombine.high %v3309_v32, %v3317_v17  ;;  %v3318_v3 = vcombine.low %v3293_v26, %v3301_v31  ;;  %v3334_v55 = vcombine.low %v3309_v32, %v3317_v17 }
0x1022   :  { %v3354_v9 = vcombine.low %v3258_v37, %v3265_v19  ;;  %v3853_v1 = vcombine.high %v3258_v37, %v3265_v19  ;;  %v3370_v4 = vcombine.low %v3274_v50, %v3281_v33  ;;  %v3854_v27 = vcombine.high %v3274_v50, %v3281_v33  ;;  %v3860_v37 = vld [vmem:[%s5220_s6 + $0x1] ss:$0 sm:$0xff] }
0x1023   :  { %v3326_v35 = vrot.slane %v3318_v3, %v4436_v61  ;;  %v3342_v38 = vrot.slane %v3334_v55, %v4436_v61  ;;  %v3333_v10 = vrot.slane %v3319_v63, %v4436_v61  ;;  %v3349_v40 = vrot.slane %v3335_v28, %v4436_v61 }
0x1024   :  { %v3361_v11 = vrot.slane %v3354_v9, %v4417_v54  ;;  %v3369_v6 = vrot.slane %v3853_v1, %v4417_v54  ;;  %v3377_v39 = vrot.slane %v3370_v4, %v4417_v54  ;;  %v3385_v48 = vrot.slane %v3854_v27, %v4417_v54 }
0x1025   :  { %v3350_v34 = vcombine.low %v3326_v35, %v3342_v38  ;;  %v3352_v46 = vcombine.low %v3333_v10, %v3349_v40  ;;  %v3351_v53 = vcombine.high %v3326_v35, %v3342_v38  ;;  %v3353_v44 = vcombine.high %v3333_v10, %v3349_v40  ;;  %v4150_v10 = vld [vmem:[%s5221_s7 + $0x18] sm:$0xff]   ;;  %v4151_v40 = vld [vmem:[%s5221_s7 + $0x10] sm:$0xff]  }
0x1026   :  { %v3387_v12 = vcombine.high %v3361_v11, %v3369_v6  ;;  %v3403_v49 = vcombine.high %v3377_v39, %v3385_v48  ;;  %v3386_v16 = vcombine.low %v3361_v11, %v3369_v6  ;;  %v3402_v42 = vcombine.low %v3377_v39, %v3385_v48 }
0x1028   :  { %v3401_v43 = vrot.slane %v3387_v12, %v4436_v61  ;;  %v3417_v14 = vrot.slane %v3403_v49, %v4436_v61  ;;  %v3394_v45 = vrot.slane %v3386_v16, %v4436_v61  ;;  %v3410_v54 = vrot.slane %v3402_v42, %v4436_v61  ;;  %v4153_v12 = vld [vmem:[%s5223_s9 + $0x30] sm:$0xff]  }
0x102a   :  { %v3420_v47 = vcombine.low %v3401_v43, %v3417_v14  ;;  %v3419_v56 = vcombine.high %v3394_v45, %v3410_v54  ;;  %v3418_v58 = vcombine.low %v3394_v45, %v3410_v54  ;;  %v3421_v62 = vcombine.high %v3401_v43, %v3417_v14 }
0x102c   :  { %v4126_v59 = vpack.i.bf16 %v3420_v47, %v3352_v46  ;;  %v4121_v60 = vpack.i.bf16 %v3419_v56, %v3351_v53  ;;  %v4131_v2 = vpack.i.bf16 %v3421_v62, %v3353_v44  ;;  %v4251_v47 = vld [vmem:[%s5216_s2 + $0x4] sm:$0xf] }
0x102d   :  { %v3553_v53 = vrot.slane %v4251_v47, %v1720_v41  ;;  %v4155_v41 = vld [vmem:[%s5223_s9 + $0x20] sm:$0xff]  }
0x102e   :  { %4127 = vrot.lane.b32.xlu0 %v4126_v59, %s4283_s26  ;;  %4122 = vrot.lane.b32.xlu1 %v4121_v60, %s4284_s27  ;;  %v3559_v60 = vrot.slane %v4251_v47, %v1726_v51 }
0x1032   :  { %4132 = vrot.lane.b32.xlu1 %v4131_v2, %s4285_s28 }
0x10a0   :  { %v4128_v52 = vpop.permute.xlu0 %4127  ;;  %v4123_v57 = vpop.permute.xlu1 %4122 }
0x10a1   :  { %v4125_v0 = vunpack.i.h.bf16 %v4123_v57  ;;  %v4124_v61 = vunpack.i.l.bf16 %v4123_v57  ;;  %v4130_v13 = vunpack.i.h.bf16 %v4128_v52  ;;  %v4129_v5 = vunpack.i.l.bf16 %v4128_v52  ;;  %v4154_v57 = vld [vmem:[%s5223_s9 + $0x28] sm:$0xff]  }
0x10a3   :  { %v3446_v7 = vsel %vm1054_vm2, %v3350_v34, %v4124_v61  ;;  %v3447_v20 = vsel %vm1054_vm2, %v3418_v58, %v4125_v0  ;;  %v4152_v34 = vld [vmem:[%s5223_s9 + $0x38] sm:$0xff]  }
0x10a4   :  { %v4133_v18 = vpop.permute.xlu1 %4132  ;;  %v3448_v23 = vsel %vm1616_vm4, %v3446_v7, %v4129_v5  ;;  %v3449_v26 = vsel %vm1616_vm4, %v3447_v20, %v4130_v13  ;;  %4073 = vmatpush3.bf16.msra.mxu1 %v4152_v34 }
0x10a5   :  { %v4135_v21 = vunpack.i.h.bf16 %v4133_v18  ;;  %v4134_v22 = vunpack.i.l.bf16 %v4133_v18  ;;  %4074 = vmatprep.subr.bf16.mxu1 %v4274_v15 }
0x10a7   :  { %v3450_v31 = vsel %vm1619_vm5, %v3448_v23, %v4134_v22  ;;  %v3451_v32 = vsel %vm1619_vm5, %v3449_v26, %v4135_v21 }
0x10a8   :  { %v3452_v17 = vpack.c.bf16 %v3451_v32, %v3450_v31  ;;  %4075 = vmatpush3.bf16.msra.mxu1 %v4153_v12 }
0x10a9   :  { %4076 = vmatprep.subr.bf16.mxu1 %v4274_v15 }
0x10aa   :  { %4061 = vmatmul.mubr.msk.bf16.vlgmr.msra.gmra.mxu0 %vm54_vm0, %v3452_v17 }
0x10ab   :  { %4068 = vmatprep.mubr.msk.bf16.mxu0 %vm4275_vm1, %v4274_v15  ;;  %4065 = vmatpush3.bf16.msra.mxu0 %v4150_v10 }
0x10ac   :  { %4066 = vmatprep.subr.bf16.mxu0 %v4274_v15  ;;  %4077 = vmatpush3.bf16.msra.mxu1 %v4154_v57 }
0x10ad   :  { %4078 = vmatprep.subr.bf16.mxu1 %v4274_v15  ;;  %v3882_v15 = vld [vmem:[%s5224_s10 + $0x1] ss:$0 sm:$0xff]  ;;  %s4286_s10 = smov [#allocation2]  }
0x10ae   :  { %s3768_s3 = sshll.u32 %s4286_s10, 4  ;;  %s3769_s3 = int_to_ptr.vmem [resolvable:$true] %s3768_s3 }
0x10af   :  { %4067 = vmatpush3.bf16.msra.mxu0 %v4151_v40  ;;  %p4257_p1 = scmp.lt.s32.totalorder %s3769_s3, %s3769_s3 }
0x10b0   :  { %4079 = vmatpush3.bf16.msra.mxu1 %v4155_v41 }
0x116a   :  { %v3515_v19 = vpop.f32.mrf.mxu0 }
0x116b   :  { %v3516_v50 = vadd.f32 %v3860_v37, %v3515_v19 }
0x116c   :  { %v4062_v33 = vpop.f32.mrf.mxu0 }
0x116d   :  { %v5147_v63 = vadd.f32 %v3516_v50, %v4787_v29 }
0x116e   :  { %v3518_v28 = vpop.f32.mrf.mxu0 }
0x116f   :  { %v3519_v3 = vadd.f32 %v3860_v37, %v3518_v28  ;;  %v3524_v55 = vsel %vm54_vm0, %v5147_v63, 0.0 }
0x1170   :  { %3525 = vadd.xlane.f32.xlu1 %v3524_v55  ;;  %v4063_v9 = vpop.f32.mrf.mxu0 }
0x1171   :  { %v5152_v1 = vadd.f32 %v3519_v3, %v4792_v36 }
0x1173   :  { %v3527_v4 = vsel %vm54_vm0, %v5152_v1, 0.0 }
0x1174   :  { %3528 = vadd.xlane.f32.xlu0 %v3527_v4 }
0x11f9   :  { %v3526_v27 = vpop.xlane.xlu1 %3525 }
0x11fa   :  { %v3530_v35 = vmul.f32 0.03125, %v3526_v27 }
0x11fc   :  { %v3532_v38 = vsub.f32 %v5147_v63, %v3530_v35 }
0x11fd   :  { %v3529_v29 = vpop.xlane.xlu0 %3528 }
0x11fe   :  { %v3531_v8 = vmul.f32 0.03125, %v3529_v29  ;;  %v3534_v11 = vmul.f32 %v3532_v38, %v3532_v38 }
0x1200   :  { %v3533_v6 = vsub.f32 %v5152_v1, %v3531_v8  ;;  %v3536_v39 = vsel %vm54_vm0, %v3534_v11, 0.0 }
0x1201   :  { %3537 = vadd.xlane.f32.xlu0 %v3536_v39 }
0x1202   :  { %v3535_v48 = vmul.f32 %v3533_v6, %v3533_v6 }
0x1204   :  { %v3539_v36 = vsel %vm54_vm0, %v3535_v48, 0.0 }
0x1205   :  { %3540 = vadd.xlane.f32.xlu1 %v3539_v36  ;;  %v3722_v36 = vld [vmem:[%s5225_s11] sm:$0x3]  ;;  %s4252_s11 = scalar_lea.vmem %s3769_s3, 256 }
0x1206   :  { %v3752_v10 = vrot.slane %v3722_v36, %v4376_v25  ;;  %v3758_v12 = vrot.slane %v3722_v36, %v4383_v30  ;;  %p4253_p0 = scmp.ne.s32.totalorder %s3769_s3, %s4252_s11  ;;  %p4258_p2 = scmp.lt.s32.totalorder %s4252_s11, %s4252_s11 }
0x1208   :  { %p4259_p3 = por %p4258_p2, %p4257_p1 }
0x120a   :  { %p4260_p4 = pnand %p4259_p3, %p4253_p0 }
0x128a   :  { %v3538_v49 = vpop.xlane.xlu0 %3537 }
0x128b   :  { %v3542_v16 = vmul.f32 0.03125, %v3538_v49 }
0x128d   :  { %v3544_v42 = vadd.f32 1e-05, %v3542_v16 }
0x128e   :  { %v3541_v43 = vpop.xlane.xlu1 %3540 }
0x128f   :  { %4232 = vrsqrt.f32 %v3544_v42  ;;  %v3543_v14 = vmul.f32 0.03125, %v3541_v43 }
0x1291   :  { %v3545_v45 = vadd.f32 1e-05, %v3543_v14 }
0x1293   :  { %4234 = vrsqrt.f32 %v3545_v45 }
0x129c   :  { %v4233_v54 = vpop.eup %4232 }
0x129d   :  { %v3548_v46 = vmul.f32 %v4233_v54, %v3532_v38 }
0x129f   :  { %v3554_v59 = vmul.f32 %v3553_v53, %v3548_v46 }
0x12a0   :  { %v4235_v56 = vpop.eup %4234 }
0x12a1   :  { %v3549_v58 = vmul.f32 %v4235_v56, %v3533_v6  ;;  %v3560_v44 = vadd.f32 %v3559_v60, %v3554_v59 }
0x12a3   :  { %v3555_v62 = vmul.f32 %v3553_v53, %v3549_v58 }
0x12a5   :  { %v3561_v2 = vadd.f32 %v3559_v60, %v3555_v62 }
0x12a7   :  { %v3562_v52 = vpack.c.bf16 %v3561_v2, %v3560_v44 }
0x12a9   :  { %4069 = vmatmul.mubr.msk.bf16.vlgmr.msra.gmra.mxu0 %vm54_vm0, %v3562_v52 }
0x1369   :  { %v3625_v51 = vpop.f32.mrf.mxu0 }
0x136a   :  { %v3626_v61 = vadd.f32 %v3869_v24, %v3625_v51 }
0x136b   :  { %v4070_v0 = vpop.f32.mrf.mxu0 }
0x136c   :  { %v3632_v20 = vmax.f32 %v3626_v61, 0.0 }
0x136d   :  { %v3628_v13 = vpop.f32.mrf.mxu0 }
0x136e   :  { %v3629_v5 = vadd.f32 %v3869_v24, %v3628_v13 }
0x136f   :  { %v4071_v7 = vpop.f32.mrf.mxu0 }
0x1370   :  { %v3633_v18 = vmax.f32 %v3629_v5, 0.0 }
0x1372   :  { %v3634_v21 = vpack.c.bf16 %v3633_v18, %v3632_v20 }
0x1374   :  { %4081 = vmatmul.mubr.msk.bf16.vlgmr.msra.gmra.mxu1 %vm1144_vm3, %v3634_v21 }
0x1434   :  { %v3713_v22 = vpop.f32.mrf.mxu1 }
0x1435   :  { %v3714_v23 = vadd.f32 %v3882_v15, %v3713_v22 }
0x1436   :  { %v4082_v26 = vpop.f32.mrf.mxu1 }
0x1437   :  { %v3720_v31 = vadd.f32 %v3714_v23, %v5147_v63 }
0x1438   :  { %v3716_v32 = vpop.f32.mrf.mxu1 }
0x1439   :  { %v3717_v17 = vadd.f32 %v3882_v15, %v3716_v32  ;;  %v3723_v37 = vsel %vm54_vm0, %v3720_v31, 0.0 }
0x143a   :  { %3724 = vadd.xlane.f32.xlu0 %v3723_v37  ;;  %v4083_v19 = vpop.f32.mrf.mxu1 }
0x143b   :  { %v3721_v50 = vadd.f32 %v3717_v17, %v5152_v1 }
0x143d   :  { %v3726_v33 = vsel %vm54_vm0, %v3721_v50, 0.0 }
0x143e   :  { %3727 = vadd.xlane.f32.xlu1 %v3726_v33 }
0x14c3   :  { %v3725_v28 = vpop.xlane.xlu0 %3724 }
0x14c4   :  { %v3729_v3 = vmul.f32 0.03125, %v3725_v28 }
0x14c6   :  { %v3731_v55 = vsub.f32 %v3720_v31, %v3729_v3 }
0x14c7   :  { %v3728_v9 = vpop.xlane.xlu1 %3727 }
0x14c8   :  { %v3730_v4 = vmul.f32 0.03125, %v3728_v9  ;;  %v3733_v27 = vmul.f32 %v3731_v55, %v3731_v55 }
0x14ca   :  { %v3732_v35 = vsub.f32 %v3721_v50, %v3730_v4  ;;  %v3735_v63 = vsel %vm54_vm0, %v3733_v27, 0.0 }
0x14cb   :  { %3736 = vadd.xlane.f32.xlu0 %v3735_v63 }
0x14cc   :  { %v3734_v38 = vmul.f32 %v3732_v35, %v3732_v35 }
0x14ce   :  { %v3738_v29 = vsel %vm54_vm0, %v3734_v38, 0.0 }
0x14cf   :  { %3739 = vadd.xlane.f32.xlu1 %v3738_v29 }
0x1554   :  { %v3737_v8 = vpop.xlane.xlu0 %3736 }
0x1555   :  { %v3741_v11 = vmul.f32 0.03125, %v3737_v8 }
0x1557   :  { %v3743_v1 = vadd.f32 1e-05, %v3741_v11 }
0x1558   :  { %v3740_v6 = vpop.xlane.xlu1 %3739 }
0x1559   :  { %4236 = vrsqrt.f32 %v3743_v1  ;;  %v3742_v39 = vmul.f32 0.03125, %v3740_v6 }
0x155b   :  { %v3744_v48 = vadd.f32 1e-05, %v3742_v39 }
0x155d   :  { %4238 = vrsqrt.f32 %v3744_v48 }
0x1566   :  { %v4237_v40 = vpop.eup %4236 }
0x1567   :  { %v3747_v34 = vmul.f32 %v4237_v40, %v3731_v55 }
0x1569   :  { %v3753_v49 = vmul.f32 %v3752_v10, %v3747_v34 }
0x156a   :  { %v4239_v16 = vpop.eup %4238 }
0x156b   :  { %v3748_v42 = vmul.f32 %v4239_v16, %v3732_v35  ;;  %v3759_v43 = vadd.f32 %v3758_v12, %v3753_v49 }
0x156d   :  { %v3754_v14 = vmul.f32 %v3752_v10, %v3748_v42  ;;  %3761 = vst.msk [vmem:[#allocation2] sm:$0xff] %vm54_vm0, %v3759_v43 }
0x156f   :  { %v3760_v45 = vadd.f32 %v3758_v12, %v3754_v14 }
0x1571   :  { %3762 = vst.msk [vmem:[#allocation2 + $0x8] sm:$0xff] %vm54_vm0, %v3760_v45 }
0x1572   :  { %4263 = shalt.err (!%p4260_p4)
}
0x1573   :  { %s4287_s1 = smov 128  }
0x1574   :  { %3774 = dma.vmem_to_hbm [thread:$0]  %s3769_s3, 256, %s5226_s12, [#allocation3], %s4287_s1, %s4287_s1, %s4284_s27  }
0x1575   :  { %4272 = dma.done.wait [#allocation3], 256  }
0x1576   :  { %4273 = vsyncadd [#allocation3], 4294967040 }
0x1577   :  { %3778 = vsyncpa [#allocation3], 1 }

</bundles_post_ra>
